<compile_context>
chip_gen: v7x
topology: tpu7x:2x2x1
jax: 0.10.0
libtpu: 0.0.40
codegen_flags: <defaults>
</compile_context>

<pallas_src>
import jax
import jax.numpy as jnp
from jax.experimental import pallas as pl
from jax.experimental.pallas import tpu as pltpu


def bilstm_attn_kernel(x_ref, wih_ref, bias_ref, whh_ref,
                       attw_ref, fcw_ref, fcb_ref, out_ref):
    """x_ref: (T, Bt, I) time-major tile.  out_ref: (Bt, P) packed [fc | attn | 0-pad]."""
    T, Bt, _ = x_ref.shape
    H = whh_ref.shape[0] // 2
    G = whh_ref.shape[1]                 # 8H; gate columns [i|f|o|g], each [fwd H | bwd H]
    C = fcb_ref.shape[1]
    f32 = jnp.float32

    # --- one big input projection for both directions, biases folded in ----------
    x2d = x_ref[...].reshape(T * Bt, x_ref.shape[2])
    xp = jnp.dot(x2d, wih_ref[...], preferred_element_type=f32) + bias_ref[...]  # (T*Bt, 8H)

    whh = whh_ref[...]                                                           # (2H, 8H)

    # Static lane mask (hoisted): forward-direction lanes inside each [fwd|bwd] pair.
    lane = jax.lax.broadcasted_iota(jnp.int32, (1, G), 1)
    fwd_mask = (lane % (2 * H)) < H

    # Interleave independent batch sub-chains once the tile is big enough to hide the
    # MXU -> VPU -> EUP -> VPU per-step latency chain of a single chain.
    n_sub = 2 if (Bt >= 16 and Bt % 16 == 0) else 1
    Bs = Bt // n_sub

    hs = [jnp.zeros((Bs, 2 * H), f32) for _ in range(n_sub)]
    cs = [jnp.zeros((Bs, 2 * H), f32) for _ in range(n_sub)]
    h_fwd = [[None] * T for _ in range(n_sub)]
    h_bwd = [[None] * T for _ in range(n_sub)]

    # TODO(synk): for production T (>~32) move per-timestep hiddens out of the static
    # Python unroll into a VMEM scratch / fori_loop carry to bound live ranges; the
    # Python lists are fine at the small T used here.
    for s in range(T):
        rs = T - 1 - s
        # Forward lanes take the projection at time s, backward lanes at time rs:
        # one VPU select instead of 4 lane concats per step.
        x_in = jnp.where(fwd_mask,
                         xp[s * Bt:(s + 1) * Bt, :],
                         xp[rs * Bt:(rs + 1) * Bt, :])                            # (Bt, 8H)
        for j in range(n_sub):
            pre = (jnp.dot(hs[j], whh, preferred_element_type=f32)
                   + x_in[j * Bs:(j + 1) * Bs, :])                                # (Bs, 8H)
            sig = jax.nn.sigmoid(pre[:, :6 * H])     # one wide EUP issue: [i | f | o]
            g_g = jnp.tanh(pre[:, 6 * H:])           # [g] gate
            i_g = sig[:, 0:2 * H]
            f_g = sig[:, 2 * H:4 * H]
            o_g = sig[:, 4 * H:6 * H]
            cs[j] = f_g * cs[j] + i_g * g_g
            hs[j] = o_g * jnp.tanh(cs[j])
            h_fwd[j][s] = hs[j][:, :H]               # forward hidden at time s
            h_bwd[j][rs] = hs[j][:, H:]              # backward hidden at time rs

    # --- epilogue: attention + context + FC on one stacked slab -------------------
    lstm_out = jnp.concatenate(
        [jnp.concatenate([jnp.stack(h_fwd[j], axis=1),
                          jnp.stack(h_bwd[j], axis=1)], axis=-1)
         for j in range(n_sub)], axis=0)                                          # (Bt, T, 2H)

    aw = attw_ref[...].reshape(1, 1, 2 * H)
    scores = jnp.sum(lstm_out * aw, axis=-1)                                      # (Bt, T)
    m = jnp.max(scores, axis=-1, keepdims=True)
    e = jnp.exp(scores - m)
    attn = e / jnp.sum(e, axis=-1, keepdims=True)     # exact divide (attn tolerance)

    ctx = jnp.sum(lstm_out * attn[:, :, None], axis=1)                            # (Bt, 2H)

    if C == 1:
        # VPU multiply + lane reduce; skip the 1-lane MXU matmul entirely.
        out = jnp.sum(ctx * fcw_ref[...], axis=-1, keepdims=True) + fcb_ref[...]
    else:
        out = jnp.dot(ctx, fcw_ref[...], preferred_element_type=f32) + fcb_ref[...]

    # Single lane-dense packed store: [fc out | attention | zero pad].
    pad = out_ref.shape[1] - C - T
    out_ref[...] = jnp.concatenate([out, attn, jnp.zeros((Bt, pad), f32)], axis=-1)


def bilstm_attention_forward(x, p, *, mxu_dtype=None):
    """mxu_dtype=jnp.bfloat16 casts the big-projection operands for production on
    v6e/v7x (loosen test tolerances accordingly); the demo keeps float32."""
    B, T, I = x.shape
    H = p["w_hh_f"].shape[1]
    C = p["fc_w"].shape[0]
    f32 = jnp.float32
    proj_dt = f32 if mxu_dtype is None else mxu_dtype

    # ---- parameter glue (layout plumbing only) -----------------------------------
    wih_f_t = p["w_ih_f"].T.astype(f32)         # (I, 4H), PyTorch gate order [i f g o]
    wih_b_t = p["w_ih_b"].T.astype(f32)
    whh_f_t = p["w_hh_f"].T.astype(f32)         # (H, 4H)
    whh_b_t = p["w_hh_b"].T.astype(f32)
    b_f = (p["b_ih_f"] + p["b_hh_f"]).astype(f32)
    b_b = (p["b_ih_b"] + p["b_hh_b"]).astype(f32)

    # Fused column order: sigmoid gates first [i | f | o], tanh gate [g] last; each
    # gate's columns interleaved [fwd H | bwd H].  The recurrent weight is block-
    # diagonal over directions so one (B,2H)@(2H,8H) matmul drives both directions.
    GATES = (0, 1, 3, 2)                        # [i, f, o, g] picked from PyTorch order
    zH = jnp.zeros((H, H), f32)
    wih_cols, b_cols, whh_cols = [], [], []
    for g in GATES:
        sl = slice(g * H, (g + 1) * H)
        wih_cols += [wih_f_t[:, sl], wih_b_t[:, sl]]
        b_cols += [b_f[sl], b_b[sl]]
        whh_cols += [jnp.concatenate([whh_f_t[:, sl], zH], axis=0),
                     jnp.concatenate([zH, whh_b_t[:, sl]], axis=0)]
    wih_cat = jnp.concatenate(wih_cols, axis=1).astype(proj_dt)   # (I, 8H)
    b_cat = jnp.concatenate(b_cols)[None, :]                      # (1, 8H)
    whh_bd = jnp.concatenate(whh_cols, axis=1)                    # (2H, 8H)

    att_w = p["att_w"].astype(f32).reshape(1, 2 * H)   # att_b dropped (softmax shift-inv.)
    fc_b = p["fc_b"].astype(f32).reshape(1, C)
    fc_w = (p["fc_w"].astype(f32).reshape(1, 2 * H) if C == 1
            else p["fc_w"].T.astype(f32))              # (1,2H) VPU path / (2H,C) MXU path

    # ---- batch padding / tiling ----------------------------------------------------
    B8 = -(-B // 8) * 8                          # pad batch to full sublanes
    if B8 <= 128:
        B_tile, B_pad = B8, B8
    else:
        B_tile = 128                             # re-derive smaller for v7x's 64 MiB VMEM
        B_pad = -(-B // 128) * 128
    nb = B_pad // B_tile

    x_f = x.astype(proj_dt)
    if B_pad > B:
        x_f = jnp.concatenate([x_f, jnp.zeros((B_pad - B, T, I), x_f.dtype)], axis=0)
    x_tm = jnp.transpose(x_f, (1, 0, 2))         # (T, B_pad, I) time-major

    # Packed lane-dense output slab: lanes [0:C] = fc out, [C:C+T] = attention weights.
    P = -(-(C + T) // 128) * 128

    const = lambda b: (0, 0)
    cost = pl.CostEstimate(
        flops=(2 * T * B_pad * I * 8 * H            # input projection
               + 2 * T * B_pad * 2 * H * 8 * H      # fused recurrence
               + 4 * B_pad * T * 2 * H              # attention scores + context
               + 2 * B_pad * 2 * H * C),            # final FC
        transcendentals=T * B_pad * 10 * H + B_pad * T,
        bytes_accessed=4 * (x_tm.size + wih_cat.size + whh_bd.size + b_cat.size
                            + att_w.size + fc_w.size + fc_b.size + B_pad * P))

    packed = pl.pallas_call(
        bilstm_attn_kernel,
        out_shape=jax.ShapeDtypeStruct((B_pad, P), f32),
        grid=(nb,),
        in_specs=[pl.BlockSpec((T, B_tile, I), lambda b: (0, b, 0)),
                  pl.BlockSpec((I, 8 * H), const),
                  pl.BlockSpec((1, 8 * H), const),
                  pl.BlockSpec((2 * H, 8 * H), const),
                  pl.BlockSpec((1, 2 * H), const),
                  pl.BlockSpec(fc_w.shape, const),
                  pl.BlockSpec((1, C), const)],
        out_specs=pl.BlockSpec((B_tile, P), lambda b: (b, 0)),
        compiler_params=pltpu.CompilerParams(
            dimension_semantics=("parallel",)),
        cost_estimate=cost,
    )(x_tm, wih_cat, b_cat, whh_bd, att_w, fc_w, fc_b)

    out = packed[:B, :C]
    attn = packed[:B, C:C + T].reshape(B, T, 1)
    return out, attn


def make_params(key, input_size, hidden_size, num_classes):
    """Deterministic synthetic parameters matching the PyTorch module shapes."""
    ks = jax.random.split(key, 12)
    k_lstm = 1.0 / float(hidden_size) ** 0.5
    k_att = 1.0 / float(2 * hidden_size) ** 0.5
    u = lambda kk, shape, b: jax.random.uniform(kk, shape, jnp.float32, -b, b)
    return {
        "w_ih_f": u(ks[0], (4 * hidden_size, input_size), k_lstm),
        "w_hh_f": u(ks[1], (4 * hidden_size, hidden_size), k_lstm),
        "b_ih_f": u(ks[2], (4 * hidden_size,), k_lstm),
        "b_hh_f": u(ks[3], (4 * hidden_size,), k_lstm),
        "w_ih_b": u(ks[4], (4 * hidden_size, input_size), k_lstm),
        "w_hh_b": u(ks[5], (4 * hidden_size, hidden_size), k_lstm),
        "b_ih_b": u(ks[6], (4 * hidden_size,), k_lstm),
        "b_hh_b": u(ks[7], (4 * hidden_size,), k_lstm),
        "att_w": u(ks[8], (1, 2 * hidden_size), k_att),
        "att_b": u(ks[9], (1,), k_att),
        "fc_w": u(ks[10], (num_classes, 2 * hidden_size), k_att),
        "fc_b": u(ks[11], (num_classes,), k_att),
    }


def reference_forward(x, p):
    """Pure-JAX reference mirroring the PyTorch module semantics."""
    B, T, _ = x.shape
    H = p["w_hh_f"].shape[1]

    def direction(w_ih, w_hh, b_ih, b_hh, reverse):
        h = jnp.zeros((B, H), jnp.float32)
        c = jnp.zeros((B, H), jnp.float32)
        outs = [None] * T
        order = range(T - 1, -1, -1) if reverse else range(T)
        for t in order:
            g = x[:, t, :] @ w_ih.T + h @ w_hh.T + b_ih + b_hh
            i = jax.nn.sigmoid(g[:, :H])
            f = jax.nn.sigmoid(g[:, H:2 * H])
            gg = jnp.tanh(g[:, 2 * H:3 * H])
            o = jax.nn.sigmoid(g[:, 3 * H:])
            c = f * c + i * gg
            h = o * jnp.tanh(c)
            outs[t] = h
        return jnp.stack(outs, axis=1)

    hf = direction(p["w_ih_f"], p["w_hh_f"], p["b_ih_f"], p["b_hh_f"], False)
    hb = direction(p["w_ih_b"], p["w_hh_b"], p["b_ih_b"], p["b_hh_b"], True)
    lstm_out = jnp.concatenate([hf, hb], axis=-1)
    scores = lstm_out @ p["att_w"].T + p["att_b"]
    attn = jax.nn.softmax(scores, axis=1)
    context = (lstm_out * attn).sum(axis=1)
    out = context @ p["fc_w"].T + p["fc_b"]
    return out, attn


if __name__ == "__main__":
    B, T, INPUT_SIZE, HIDDEN, NUM_CLASSES = 2, 8, 16, 32, 1

    key = jax.random.PRNGKey(0)
    kx, kp = jax.random.split(key)
    x = jax.random.normal(kx, (B, T, INPUT_SIZE), jnp.float32)
    params = make_params(kp, INPUT_SIZE, HIDDEN, NUM_CLASSES)

    out, attn = bilstm_attention_forward(x, params)
    out, attn = jax.block_until_ready((out, attn))

    ref_out, ref_attn = reference_forward(x, params)
    assert out.shape == (B, NUM_CLASSES) and attn.shape == (B, T, 1)
    assert jnp.allclose(out, ref_out, atol=1e-4, rtol=1e-4)
    assert jnp.allclose(attn, ref_attn, atol=2e-5, rtol=1e-4)

    print("KERNEL_OK")
</pallas_src>

<mosaic_0001>
module attributes {stable_mosaic.version = 11 : i64} {
  func.func @bilstm_attn_kernel(%arg0: i32, %arg1: memref<8x8x16xf32, #tpu.memory_space<vmem>>, %arg2: memref<16x256xf32, #tpu.memory_space<vmem>>, %arg3: memref<1x256xf32, #tpu.memory_space<vmem>>, %arg4: memref<64x256xf32, #tpu.memory_space<vmem>>, %arg5: memref<1x64xf32, #tpu.memory_space<vmem>>, %arg6: memref<1x64xf32, #tpu.memory_space<vmem>>, %arg7: memref<1x1xf32, #tpu.memory_space<vmem>>, %arg8: memref<8x128xf32, #tpu.memory_space<vmem>>) attributes {dimension_semantics = [#tpu.dimension_semantics<parallel>], iteration_bounds = array<i64: 1>, scalar_prefetch = 0 : i64, scratch_operands = 0 : i64, tpu.core_type = #tpu.core_type<tc>, window_params = [{transform_indices = @transform_0, window_bounds = array<i64: 8, 8, 16>}, {pipeline_mode = #tpu.pipeline_mode<synchronous>, transform_indices = @transform_1, window_bounds = array<i64: 16, 256>}, {pipeline_mode = #tpu.pipeline_mode<synchronous>, transform_indices = @transform_2, window_bounds = array<i64: 1, 256>}, {pipeline_mode = #tpu.pipeline_mode<synchronous>, transform_indices = @transform_3, window_bounds = array<i64: 64, 256>}, {pipeline_mode = #tpu.pipeline_mode<synchronous>, transform_indices = @transform_4, window_bounds = array<i64: 1, 64>}, {pipeline_mode = #tpu.pipeline_mode<synchronous>, transform_indices = @transform_5, window_bounds = array<i64: 1, 64>}, {pipeline_mode = #tpu.pipeline_mode<synchronous>, transform_indices = @transform_6, window_bounds = array<i64: 1, 1>}, {transform_indices = @transform_7, window_bounds = array<i64: 8, 128>}]} {
    %c0 = arith.constant 0 : index
    %c0_0 = arith.constant 0 : index
    %c0_1 = arith.constant 0 : index
    %0 = vector.load %arg1[%c0, %c0_0, %c0_1] : memref<8x8x16xf32, #tpu.memory_space<vmem>>, vector<8x8x16xf32>
    %1 = vector.shape_cast %0 : vector<8x8x16xf32> to vector<64x16xf32>
    %c0_2 = arith.constant 0 : index
    %c0_3 = arith.constant 0 : index
    %2 = vector.load %arg2[%c0_2, %c0_3] : memref<16x256xf32, #tpu.memory_space<vmem>>, vector<16x256xf32>
    %cst = arith.constant dense<0.000000e+00> : vector<64x256xf32>
    %3 = tpu.matmul %1, %2, %cst {dimension_numbers = #tpu.dot_dimension_numbers<[1], [0], [0], [1], [0, 0, 1, 1], [], []>} : vector<64x16xf32>, vector<16x256xf32>, vector<64x256xf32> -> vector<64x256xf32>
    %c0_4 = arith.constant 0 : index
    %c0_5 = arith.constant 0 : index
    %4 = vector.load %arg3[%c0_4, %c0_5] : memref<1x256xf32, #tpu.memory_space<vmem>>, vector<1x256xf32>
    %5 = vector.broadcast %4 : vector<1x256xf32> to vector<64x256xf32>
    %6 = arith.addf %3, %5 : vector<64x256xf32>
    %c0_6 = arith.constant 0 : index
    %c0_7 = arith.constant 0 : index
    %7 = vector.load %arg4[%c0_6, %c0_7] : memref<64x256xf32, #tpu.memory_space<vmem>>, vector<64x256xf32>
    %8 = tpu.iota {dimensions = array<i32: 1>} : vector<1x256xi32>
    %c64_i32 = arith.constant 64 : i32
    %c0_i32 = arith.constant 0 : i32
    %9 = arith.cmpi eq, %c64_i32, %c0_i32 : i32
    %c1_i32 = arith.constant 1 : i32
    %10 = arith.select %9, %c1_i32, %c64_i32 : i32
    %11 = vector.broadcast %10 : i32 to vector<1x256xi32>
    %12 = arith.remsi %8, %11 : vector<1x256xi32>
    %c0_i32_8 = arith.constant 0 : i32
    %13 = vector.broadcast %c0_i32_8 : i32 to vector<1x256xi32>
    %14 = arith.cmpi ne, %12, %13 : vector<1x256xi32>
    %c0_i32_9 = arith.constant 0 : i32
    %15 = vector.broadcast %c0_i32_9 : i32 to vector<1x256xi32>
    %16 = arith.cmpi slt, %12, %15 : vector<1x256xi32>
    %c0_i32_10 = arith.constant 0 : i32
    %17 = arith.cmpi slt, %10, %c0_i32_10 : i32
    %18 = vector.broadcast %17 : i1 to vector<1x256xi1>
    %19 = vector.broadcast %18 : vector<1x256xi1> to vector<1x256xi1>
    %20 = arith.xori %16, %19 : vector<1x256xi1>
    %21 = arith.andi %20, %14 : vector<1x256xi1>
    %22 = vector.broadcast %10 : i32 to vector<1x256xi32>
    %23 = arith.addi %12, %22 : vector<1x256xi32>
    %24 = arith.select %21, %23, %12 : vector<1x256xi1>, vector<1x256xi32>
    %c32_i32 = arith.constant 32 : i32
    %25 = vector.broadcast %c32_i32 : i32 to vector<1x256xi32>
    %26 = arith.cmpi slt, %24, %25 : vector<1x256xi32>
    %cst_11 = arith.constant 0.000000e+00 : f32
    %27 = vector.broadcast %cst_11 : f32 to vector<8x64xf32>
    %cst_12 = arith.constant 0.000000e+00 : f32
    %28 = vector.broadcast %cst_12 : f32 to vector<8x64xf32>
    %29 = vector.extract_strided_slice %6 {offsets = [0, 0], sizes = [8, 256], strides = [1, 1]} : vector<64x256xf32> to vector<8x256xf32>
    %30 = vector.extract_strided_slice %6 {offsets = [56, 0], sizes = [8, 256], strides = [1, 1]} : vector<64x256xf32> to vector<8x256xf32>
    %31 = vector.shape_cast %26 : vector<1x256xi1> to vector<1x256xi1>
    %32 = vector.broadcast %31 : vector<1x256xi1> to vector<8x256xi1>
    %33 = arith.select %32, %29, %30 : vector<8x256xi1>, vector<8x256xf32>
    %cst_13 = arith.constant dense<0.000000e+00> : vector<8x256xf32>
    %34 = tpu.matmul %27, %7, %cst_13 {dimension_numbers = #tpu.dot_dimension_numbers<[1], [0], [0], [1], [0, 0, 1, 1], [], []>} : vector<8x64xf32>, vector<64x256xf32>, vector<8x256xf32> -> vector<8x256xf32>
    %35 = arith.addf %34, %33 : vector<8x256xf32>
    %36 = vector.extract_strided_slice %35 {offsets = [0, 0], sizes = [8, 192], strides = [1, 1]} : vector<8x256xf32> to vector<8x192xf32>
    %37 = arith.negf %36 : vector<8x192xf32>
    %38 = math.exp %37 : vector<8x192xf32>
    %cst_14 = arith.constant 1.000000e+00 : f32
    %39 = vector.broadcast %cst_14 : f32 to vector<8x192xf32>
    %40 = arith.addf %39, %38 : vector<8x192xf32>
    %41 = arith.divf %39, %40 : vector<8x192xf32>
    %42 = vector.extract_strided_slice %35 {offsets = [0, 192], sizes = [8, 64], strides = [1, 1]} : vector<8x256xf32> to vector<8x64xf32>
    %43 = math.tanh %42 : vector<8x64xf32>
    %44 = vector.extract_strided_slice %41 {offsets = [0, 0], sizes = [8, 64], strides = [1, 1]} : vector<8x192xf32> to vector<8x64xf32>
    %45 = vector.extract_strided_slice %41 {offsets = [0, 64], sizes = [8, 64], strides = [1, 1]} : vector<8x192xf32> to vector<8x64xf32>
    %46 = vector.extract_strided_slice %41 {offsets = [0, 128], sizes = [8, 64], strides = [1, 1]} : vector<8x192xf32> to vector<8x64xf32>
    %47 = arith.mulf %45, %28 : vector<8x64xf32>
    %48 = arith.mulf %44, %43 : vector<8x64xf32>
    %49 = arith.addf %47, %48 : vector<8x64xf32>
    %50 = math.tanh %49 : vector<8x64xf32>
    %51 = arith.mulf %46, %50 : vector<8x64xf32>
    %52 = vector.extract_strided_slice %51 {offsets = [0, 0], sizes = [8, 32], strides = [1, 1]} : vector<8x64xf32> to vector<8x32xf32>
    %53 = vector.extract_strided_slice %51 {offsets = [0, 32], sizes = [8, 32], strides = [1, 1]} : vector<8x64xf32> to vector<8x32xf32>
    %54 = vector.extract_strided_slice %6 {offsets = [8, 0], sizes = [8, 256], strides = [1, 1]} : vector<64x256xf32> to vector<8x256xf32>
    %55 = vector.extract_strided_slice %6 {offsets = [48, 0], sizes = [8, 256], strides = [1, 1]} : vector<64x256xf32> to vector<8x256xf32>
    %56 = vector.shape_cast %26 : vector<1x256xi1> to vector<1x256xi1>
    %57 = vector.broadcast %56 : vector<1x256xi1> to vector<8x256xi1>
    %58 = arith.select %57, %54, %55 : vector<8x256xi1>, vector<8x256xf32>
    %cst_15 = arith.constant dense<0.000000e+00> : vector<8x256xf32>
    %59 = tpu.matmul %51, %7, %cst_15 {dimension_numbers = #tpu.dot_dimension_numbers<[1], [0], [0], [1], [0, 0, 1, 1], [], []>} : vector<8x64xf32>, vector<64x256xf32>, vector<8x256xf32> -> vector<8x256xf32>
    %60 = arith.addf %59, %58 : vector<8x256xf32>
    %61 = vector.extract_strided_slice %60 {offsets = [0, 0], sizes = [8, 192], strides = [1, 1]} : vector<8x256xf32> to vector<8x192xf32>
    %62 = arith.negf %61 : vector<8x192xf32>
    %63 = math.exp %62 : vector<8x192xf32>
    %cst_16 = arith.constant 1.000000e+00 : f32
    %64 = vector.broadcast %cst_16 : f32 to vector<8x192xf32>
    %65 = arith.addf %64, %63 : vector<8x192xf32>
    %66 = arith.divf %64, %65 : vector<8x192xf32>
    %67 = vector.extract_strided_slice %60 {offsets = [0, 192], sizes = [8, 64], strides = [1, 1]} : vector<8x256xf32> to vector<8x64xf32>
    %68 = math.tanh %67 : vector<8x64xf32>
    %69 = vector.extract_strided_slice %66 {offsets = [0, 0], sizes = [8, 64], strides = [1, 1]} : vector<8x192xf32> to vector<8x64xf32>
    %70 = vector.extract_strided_slice %66 {offsets = [0, 64], sizes = [8, 64], strides = [1, 1]} : vector<8x192xf32> to vector<8x64xf32>
    %71 = vector.extract_strided_slice %66 {offsets = [0, 128], sizes = [8, 64], strides = [1, 1]} : vector<8x192xf32> to vector<8x64xf32>
    %72 = arith.mulf %70, %49 : vector<8x64xf32>
    %73 = arith.mulf %69, %68 : vector<8x64xf32>
    %74 = arith.addf %72, %73 : vector<8x64xf32>
    %75 = math.tanh %74 : vector<8x64xf32>
    %76 = arith.mulf %71, %75 : vector<8x64xf32>
    %77 = vector.extract_strided_slice %76 {offsets = [0, 0], sizes = [8, 32], strides = [1, 1]} : vector<8x64xf32> to vector<8x32xf32>
    %78 = vector.extract_strided_slice %76 {offsets = [0, 32], sizes = [8, 32], strides = [1, 1]} : vector<8x64xf32> to vector<8x32xf32>
    %79 = vector.extract_strided_slice %6 {offsets = [16, 0], sizes = [8, 256], strides = [1, 1]} : vector<64x256xf32> to vector<8x256xf32>
    %80 = vector.extract_strided_slice %6 {offsets = [40, 0], sizes = [8, 256], strides = [1, 1]} : vector<64x256xf32> to vector<8x256xf32>
    %81 = vector.shape_cast %26 : vector<1x256xi1> to vector<1x256xi1>
    %82 = vector.broadcast %81 : vector<1x256xi1> to vector<8x256xi1>
    %83 = arith.select %82, %79, %80 : vector<8x256xi1>, vector<8x256xf32>
    %cst_17 = arith.constant dense<0.000000e+00> : vector<8x256xf32>
    %84 = tpu.matmul %76, %7, %cst_17 {dimension_numbers = #tpu.dot_dimension_numbers<[1], [0], [0], [1], [0, 0, 1, 1], [], []>} : vector<8x64xf32>, vector<64x256xf32>, vector<8x256xf32> -> vector<8x256xf32>
    %85 = arith.addf %84, %83 : vector<8x256xf32>
    %86 = vector.extract_strided_slice %85 {offsets = [0, 0], sizes = [8, 192], strides = [1, 1]} : vector<8x256xf32> to vector<8x192xf32>
    %87 = arith.negf %86 : vector<8x192xf32>
    %88 = math.exp %87 : vector<8x192xf32>
    %cst_18 = arith.constant 1.000000e+00 : f32
    %89 = vector.broadcast %cst_18 : f32 to vector<8x192xf32>
    %90 = arith.addf %89, %88 : vector<8x192xf32>
    %91 = arith.divf %89, %90 : vector<8x192xf32>
    %92 = vector.extract_strided_slice %85 {offsets = [0, 192], sizes = [8, 64], strides = [1, 1]} : vector<8x256xf32> to vector<8x64xf32>
    %93 = math.tanh %92 : vector<8x64xf32>
    %94 = vector.extract_strided_slice %91 {offsets = [0, 0], sizes = [8, 64], strides = [1, 1]} : vector<8x192xf32> to vector<8x64xf32>
    %95 = vector.extract_strided_slice %91 {offsets = [0, 64], sizes = [8, 64], strides = [1, 1]} : vector<8x192xf32> to vector<8x64xf32>
    %96 = vector.extract_strided_slice %91 {offsets = [0, 128], sizes = [8, 64], strides = [1, 1]} : vector<8x192xf32> to vector<8x64xf32>
    %97 = arith.mulf %95, %74 : vector<8x64xf32>
    %98 = arith.mulf %94, %93 : vector<8x64xf32>
    %99 = arith.addf %97, %98 : vector<8x64xf32>
    %100 = math.tanh %99 : vector<8x64xf32>
    %101 = arith.mulf %96, %100 : vector<8x64xf32>
    %102 = vector.extract_strided_slice %101 {offsets = [0, 0], sizes = [8, 32], strides = [1, 1]} : vector<8x64xf32> to vector<8x32xf32>
    %103 = vector.extract_strided_slice %101 {offsets = [0, 32], sizes = [8, 32], strides = [1, 1]} : vector<8x64xf32> to vector<8x32xf32>
    %104 = vector.extract_strided_slice %6 {offsets = [24, 0], sizes = [8, 256], strides = [1, 1]} : vector<64x256xf32> to vector<8x256xf32>
    %105 = vector.extract_strided_slice %6 {offsets = [32, 0], sizes = [8, 256], strides = [1, 1]} : vector<64x256xf32> to vector<8x256xf32>
    %106 = vector.shape_cast %26 : vector<1x256xi1> to vector<1x256xi1>
    %107 = vector.broadcast %106 : vector<1x256xi1> to vector<8x256xi1>
    %108 = arith.select %107, %104, %105 : vector<8x256xi1>, vector<8x256xf32>
    %cst_19 = arith.constant dense<0.000000e+00> : vector<8x256xf32>
    %109 = tpu.matmul %101, %7, %cst_19 {dimension_numbers = #tpu.dot_dimension_numbers<[1], [0], [0], [1], [0, 0, 1, 1], [], []>} : vector<8x64xf32>, vector<64x256xf32>, vector<8x256xf32> -> vector<8x256xf32>
    %110 = arith.addf %109, %108 : vector<8x256xf32>
    %111 = vector.extract_strided_slice %110 {offsets = [0, 0], sizes = [8, 192], strides = [1, 1]} : vector<8x256xf32> to vector<8x192xf32>
    %112 = arith.negf %111 : vector<8x192xf32>
    %113 = math.exp %112 : vector<8x192xf32>
    %cst_20 = arith.constant 1.000000e+00 : f32
    %114 = vector.broadcast %cst_20 : f32 to vector<8x192xf32>
    %115 = arith.addf %114, %113 : vector<8x192xf32>
    %116 = arith.divf %114, %115 : vector<8x192xf32>
    %117 = vector.extract_strided_slice %110 {offsets = [0, 192], sizes = [8, 64], strides = [1, 1]} : vector<8x256xf32> to vector<8x64xf32>
    %118 = math.tanh %117 : vector<8x64xf32>
    %119 = vector.extract_strided_slice %116 {offsets = [0, 0], sizes = [8, 64], strides = [1, 1]} : vector<8x192xf32> to vector<8x64xf32>
    %120 = vector.extract_strided_slice %116 {offsets = [0, 64], sizes = [8, 64], strides = [1, 1]} : vector<8x192xf32> to vector<8x64xf32>
    %121 = vector.extract_strided_slice %116 {offsets = [0, 128], sizes = [8, 64], strides = [1, 1]} : vector<8x192xf32> to vector<8x64xf32>
    %122 = arith.mulf %120, %99 : vector<8x64xf32>
    %123 = arith.mulf %119, %118 : vector<8x64xf32>
    %124 = arith.addf %122, %123 : vector<8x64xf32>
    %125 = math.tanh %124 : vector<8x64xf32>
    %126 = arith.mulf %121, %125 : vector<8x64xf32>
    %127 = vector.extract_strided_slice %126 {offsets = [0, 0], sizes = [8, 32], strides = [1, 1]} : vector<8x64xf32> to vector<8x32xf32>
    %128 = vector.extract_strided_slice %126 {offsets = [0, 32], sizes = [8, 32], strides = [1, 1]} : vector<8x64xf32> to vector<8x32xf32>
    %129 = vector.extract_strided_slice %6 {offsets = [32, 0], sizes = [8, 256], strides = [1, 1]} : vector<64x256xf32> to vector<8x256xf32>
    %130 = vector.extract_strided_slice %6 {offsets = [24, 0], sizes = [8, 256], strides = [1, 1]} : vector<64x256xf32> to vector<8x256xf32>
    %131 = vector.shape_cast %26 : vector<1x256xi1> to vector<1x256xi1>
    %132 = vector.broadcast %131 : vector<1x256xi1> to vector<8x256xi1>
    %133 = arith.select %132, %129, %130 : vector<8x256xi1>, vector<8x256xf32>
    %cst_21 = arith.constant dense<0.000000e+00> : vector<8x256xf32>
    %134 = tpu.matmul %126, %7, %cst_21 {dimension_numbers = #tpu.dot_dimension_numbers<[1], [0], [0], [1], [0, 0, 1, 1], [], []>} : vector<8x64xf32>, vector<64x256xf32>, vector<8x256xf32> -> vector<8x256xf32>
    %135 = arith.addf %134, %133 : vector<8x256xf32>
    %136 = vector.extract_strided_slice %135 {offsets = [0, 0], sizes = [8, 192], strides = [1, 1]} : vector<8x256xf32> to vector<8x192xf32>
    %137 = arith.negf %136 : vector<8x192xf32>
    %138 = math.exp %137 : vector<8x192xf32>
    %cst_22 = arith.constant 1.000000e+00 : f32
    %139 = vector.broadcast %cst_22 : f32 to vector<8x192xf32>
    %140 = arith.addf %139, %138 : vector<8x192xf32>
    %141 = arith.divf %139, %140 : vector<8x192xf32>
    %142 = vector.extract_strided_slice %135 {offsets = [0, 192], sizes = [8, 64], strides = [1, 1]} : vector<8x256xf32> to vector<8x64xf32>
    %143 = math.tanh %142 : vector<8x64xf32>
    %144 = vector.extract_strided_slice %141 {offsets = [0, 0], sizes = [8, 64], strides = [1, 1]} : vector<8x192xf32> to vector<8x64xf32>
    %145 = vector.extract_strided_slice %141 {offsets = [0, 64], sizes = [8, 64], strides = [1, 1]} : vector<8x192xf32> to vector<8x64xf32>
    %146 = vector.extract_strided_slice %141 {offsets = [0, 128], sizes = [8, 64], strides = [1, 1]} : vector<8x192xf32> to vector<8x64xf32>
    %147 = arith.mulf %145, %124 : vector<8x64xf32>
    %148 = arith.mulf %144, %143 : vector<8x64xf32>
    %149 = arith.addf %147, %148 : vector<8x64xf32>
    %150 = math.tanh %149 : vector<8x64xf32>
    %151 = arith.mulf %146, %150 : vector<8x64xf32>
    %152 = vector.extract_strided_slice %151 {offsets = [0, 0], sizes = [8, 32], strides = [1, 1]} : vector<8x64xf32> to vector<8x32xf32>
    %153 = vector.extract_strided_slice %151 {offsets = [0, 32], sizes = [8, 32], strides = [1, 1]} : vector<8x64xf32> to vector<8x32xf32>
    %154 = vector.extract_strided_slice %6 {offsets = [40, 0], sizes = [8, 256], strides = [1, 1]} : vector<64x256xf32> to vector<8x256xf32>
    %155 = vector.extract_strided_slice %6 {offsets = [16, 0], sizes = [8, 256], strides = [1, 1]} : vector<64x256xf32> to vector<8x256xf32>
    %156 = vector.shape_cast %26 : vector<1x256xi1> to vector<1x256xi1>
    %157 = vector.broadcast %156 : vector<1x256xi1> to vector<8x256xi1>
    %158 = arith.select %157, %154, %155 : vector<8x256xi1>, vector<8x256xf32>
    %cst_23 = arith.constant dense<0.000000e+00> : vector<8x256xf32>
    %159 = tpu.matmul %151, %7, %cst_23 {dimension_numbers = #tpu.dot_dimension_numbers<[1], [0], [0], [1], [0, 0, 1, 1], [], []>} : vector<8x64xf32>, vector<64x256xf32>, vector<8x256xf32> -> vector<8x256xf32>
    %160 = arith.addf %159, %158 : vector<8x256xf32>
    %161 = vector.extract_strided_slice %160 {offsets = [0, 0], sizes = [8, 192], strides = [1, 1]} : vector<8x256xf32> to vector<8x192xf32>
    %162 = arith.negf %161 : vector<8x192xf32>
    %163 = math.exp %162 : vector<8x192xf32>
    %cst_24 = arith.constant 1.000000e+00 : f32
    %164 = vector.broadcast %cst_24 : f32 to vector<8x192xf32>
    %165 = arith.addf %164, %163 : vector<8x192xf32>
    %166 = arith.divf %164, %165 : vector<8x192xf32>
    %167 = vector.extract_strided_slice %160 {offsets = [0, 192], sizes = [8, 64], strides = [1, 1]} : vector<8x256xf32> to vector<8x64xf32>
    %168 = math.tanh %167 : vector<8x64xf32>
    %169 = vector.extract_strided_slice %166 {offsets = [0, 0], sizes = [8, 64], strides = [1, 1]} : vector<8x192xf32> to vector<8x64xf32>
    %170 = vector.extract_strided_slice %166 {offsets = [0, 64], sizes = [8, 64], strides = [1, 1]} : vector<8x192xf32> to vector<8x64xf32>
    %171 = vector.extract_strided_slice %166 {offsets = [0, 128], sizes = [8, 64], strides = [1, 1]} : vector<8x192xf32> to vector<8x64xf32>
    %172 = arith.mulf %170, %149 : vector<8x64xf32>
    %173 = arith.mulf %169, %168 : vector<8x64xf32>
    %174 = arith.addf %172, %173 : vector<8x64xf32>
    %175 = math.tanh %174 : vector<8x64xf32>
    %176 = arith.mulf %171, %175 : vector<8x64xf32>
    %177 = vector.extract_strided_slice %176 {offsets = [0, 0], sizes = [8, 32], strides = [1, 1]} : vector<8x64xf32> to vector<8x32xf32>
    %178 = vector.extract_strided_slice %176 {offsets = [0, 32], sizes = [8, 32], strides = [1, 1]} : vector<8x64xf32> to vector<8x32xf32>
    %179 = vector.extract_strided_slice %6 {offsets = [48, 0], sizes = [8, 256], strides = [1, 1]} : vector<64x256xf32> to vector<8x256xf32>
    %180 = vector.extract_strided_slice %6 {offsets = [8, 0], sizes = [8, 256], strides = [1, 1]} : vector<64x256xf32> to vector<8x256xf32>
    %181 = vector.shape_cast %26 : vector<1x256xi1> to vector<1x256xi1>
    %182 = vector.broadcast %181 : vector<1x256xi1> to vector<8x256xi1>
    %183 = arith.select %182, %179, %180 : vector<8x256xi1>, vector<8x256xf32>
    %cst_25 = arith.constant dense<0.000000e+00> : vector<8x256xf32>
    %184 = tpu.matmul %176, %7, %cst_25 {dimension_numbers = #tpu.dot_dimension_numbers<[1], [0], [0], [1], [0, 0, 1, 1], [], []>} : vector<8x64xf32>, vector<64x256xf32>, vector<8x256xf32> -> vector<8x256xf32>
    %185 = arith.addf %184, %183 : vector<8x256xf32>
    %186 = vector.extract_strided_slice %185 {offsets = [0, 0], sizes = [8, 192], strides = [1, 1]} : vector<8x256xf32> to vector<8x192xf32>
    %187 = arith.negf %186 : vector<8x192xf32>
    %188 = math.exp %187 : vector<8x192xf32>
    %cst_26 = arith.constant 1.000000e+00 : f32
    %189 = vector.broadcast %cst_26 : f32 to vector<8x192xf32>
    %190 = arith.addf %189, %188 : vector<8x192xf32>
    %191 = arith.divf %189, %190 : vector<8x192xf32>
    %192 = vector.extract_strided_slice %185 {offsets = [0, 192], sizes = [8, 64], strides = [1, 1]} : vector<8x256xf32> to vector<8x64xf32>
    %193 = math.tanh %192 : vector<8x64xf32>
    %194 = vector.extract_strided_slice %191 {offsets = [0, 0], sizes = [8, 64], strides = [1, 1]} : vector<8x192xf32> to vector<8x64xf32>
    %195 = vector.extract_strided_slice %191 {offsets = [0, 64], sizes = [8, 64], strides = [1, 1]} : vector<8x192xf32> to vector<8x64xf32>
    %196 = vector.extract_strided_slice %191 {offsets = [0, 128], sizes = [8, 64], strides = [1, 1]} : vector<8x192xf32> to vector<8x64xf32>
    %197 = arith.mulf %195, %174 : vector<8x64xf32>
    %198 = arith.mulf %194, %193 : vector<8x64xf32>
    %199 = arith.addf %197, %198 : vector<8x64xf32>
    %200 = math.tanh %199 : vector<8x64xf32>
    %201 = arith.mulf %196, %200 : vector<8x64xf32>
    %202 = vector.extract_strided_slice %201 {offsets = [0, 0], sizes = [8, 32], strides = [1, 1]} : vector<8x64xf32> to vector<8x32xf32>
    %203 = vector.extract_strided_slice %201 {offsets = [0, 32], sizes = [8, 32], strides = [1, 1]} : vector<8x64xf32> to vector<8x32xf32>
    %204 = vector.extract_strided_slice %6 {offsets = [56, 0], sizes = [8, 256], strides = [1, 1]} : vector<64x256xf32> to vector<8x256xf32>
    %205 = vector.extract_strided_slice %6 {offsets = [0, 0], sizes = [8, 256], strides = [1, 1]} : vector<64x256xf32> to vector<8x256xf32>
    %206 = vector.shape_cast %26 : vector<1x256xi1> to vector<1x256xi1>
    %207 = vector.broadcast %206 : vector<1x256xi1> to vector<8x256xi1>
    %208 = arith.select %207, %204, %205 : vector<8x256xi1>, vector<8x256xf32>
    %cst_27 = arith.constant dense<0.000000e+00> : vector<8x256xf32>
    %209 = tpu.matmul %201, %7, %cst_27 {dimension_numbers = #tpu.dot_dimension_numbers<[1], [0], [0], [1], [0, 0, 1, 1], [], []>} : vector<8x64xf32>, vector<64x256xf32>, vector<8x256xf32> -> vector<8x256xf32>
    %210 = arith.addf %209, %208 : vector<8x256xf32>
    %211 = vector.extract_strided_slice %210 {offsets = [0, 0], sizes = [8, 192], strides = [1, 1]} : vector<8x256xf32> to vector<8x192xf32>
    %212 = arith.negf %211 : vector<8x192xf32>
    %213 = math.exp %212 : vector<8x192xf32>
    %cst_28 = arith.constant 1.000000e+00 : f32
    %214 = vector.broadcast %cst_28 : f32 to vector<8x192xf32>
    %215 = arith.addf %214, %213 : vector<8x192xf32>
    %216 = arith.divf %214, %215 : vector<8x192xf32>
    %217 = vector.extract_strided_slice %210 {offsets = [0, 192], sizes = [8, 64], strides = [1, 1]} : vector<8x256xf32> to vector<8x64xf32>
    %218 = math.tanh %217 : vector<8x64xf32>
    %219 = vector.extract_strided_slice %216 {offsets = [0, 0], sizes = [8, 64], strides = [1, 1]} : vector<8x192xf32> to vector<8x64xf32>
    %220 = vector.extract_strided_slice %216 {offsets = [0, 64], sizes = [8, 64], strides = [1, 1]} : vector<8x192xf32> to vector<8x64xf32>
    %221 = vector.extract_strided_slice %216 {offsets = [0, 128], sizes = [8, 64], strides = [1, 1]} : vector<8x192xf32> to vector<8x64xf32>
    %222 = arith.mulf %220, %199 : vector<8x64xf32>
    %223 = arith.mulf %219, %218 : vector<8x64xf32>
    %224 = arith.addf %222, %223 : vector<8x64xf32>
    %225 = math.tanh %224 : vector<8x64xf32>
    %226 = arith.mulf %221, %225 : vector<8x64xf32>
    %227 = vector.extract_strided_slice %226 {offsets = [0, 0], sizes = [8, 32], strides = [1, 1]} : vector<8x64xf32> to vector<8x32xf32>
    %228 = vector.extract_strided_slice %226 {offsets = [0, 32], sizes = [8, 32], strides = [1, 1]} : vector<8x64xf32> to vector<8x32xf32>
    %229 = vector.shape_cast %52 : vector<8x32xf32> to vector<8x1x32xf32>
    %230 = vector.shape_cast %77 : vector<8x32xf32> to vector<8x1x32xf32>
    %231 = vector.shape_cast %102 : vector<8x32xf32> to vector<8x1x32xf32>
    %232 = vector.shape_cast %127 : vector<8x32xf32> to vector<8x1x32xf32>
    %233 = vector.shape_cast %152 : vector<8x32xf32> to vector<8x1x32xf32>
    %234 = vector.shape_cast %177 : vector<8x32xf32> to vector<8x1x32xf32>
    %235 = vector.shape_cast %202 : vector<8x32xf32> to vector<8x1x32xf32>
    %236 = vector.shape_cast %227 : vector<8x32xf32> to vector<8x1x32xf32>
    %237 = tpu.concatenate %229, %230, %231, %232, %233, %234, %235, %236 in 1 : vector<8x1x32xf32>, vector<8x1x32xf32>, vector<8x1x32xf32>, vector<8x1x32xf32>, vector<8x1x32xf32>, vector<8x1x32xf32>, vector<8x1x32xf32>, vector<8x1x32xf32> -> vector<8x8x32xf32>
    %238 = vector.shape_cast %228 : vector<8x32xf32> to vector<8x1x32xf32>
    %239 = vector.shape_cast %203 : vector<8x32xf32> to vector<8x1x32xf32>
    %240 = vector.shape_cast %178 : vector<8x32xf32> to vector<8x1x32xf32>
    %241 = vector.shape_cast %153 : vector<8x32xf32> to vector<8x1x32xf32>
    %242 = vector.shape_cast %128 : vector<8x32xf32> to vector<8x1x32xf32>
    %243 = vector.shape_cast %103 : vector<8x32xf32> to vector<8x1x32xf32>
    %244 = vector.shape_cast %78 : vector<8x32xf32> to vector<8x1x32xf32>
    %245 = vector.shape_cast %53 : vector<8x32xf32> to vector<8x1x32xf32>
    %246 = tpu.concatenate %238, %239, %240, %241, %242, %243, %244, %245 in 1 : vector<8x1x32xf32>, vector<8x1x32xf32>, vector<8x1x32xf32>, vector<8x1x32xf32>, vector<8x1x32xf32>, vector<8x1x32xf32>, vector<8x1x32xf32>, vector<8x1x32xf32> -> vector<8x8x32xf32>
    %247 = tpu.concatenate %237, %246 in 2 : vector<8x8x32xf32>, vector<8x8x32xf32> -> vector<8x8x64xf32>
    %c0_29 = arith.constant 0 : index
    %c0_30 = arith.constant 0 : index
    %248 = vector.load %arg5[%c0_29, %c0_30] : memref<1x64xf32, #tpu.memory_space<vmem>>, vector<1x64xf32>
    %249 = vector.shape_cast %248 : vector<1x64xf32> to vector<1x1x64xf32>
    %250 = vector.broadcast %249 : vector<1x1x64xf32> to vector<8x8x64xf32>
    %251 = arith.mulf %247, %250 : vector<8x8x64xf32>
    %cst_31 = arith.constant dense<0.000000e+00> : vector<8x8xf32>
    %252 = vector.multi_reduction <add>, %251, %cst_31 [2] : vector<8x8x64xf32> to vector<8x8xf32>
    %cst_32 = arith.constant dense<0xFF800000> : vector<8xf32>
    %253 = vector.multi_reduction <maximumf>, %252, %cst_32 [1] : vector<8x8xf32> to vector<8xf32>
    %254 = vector.shape_cast %253 : vector<8xf32> to vector<8x1xf32>
    %255 = vector.broadcast %254 : vector<8x1xf32> to vector<8x8xf32>
    %256 = arith.subf %252, %255 : vector<8x8xf32>
    %257 = math.exp %256 : vector<8x8xf32>
    %cst_33 = arith.constant dense<0.000000e+00> : vector<8xf32>
    %258 = vector.multi_reduction <add>, %257, %cst_33 [1] : vector<8x8xf32> to vector<8xf32>
    %259 = vector.shape_cast %258 : vector<8xf32> to vector<8x1xf32>
    %260 = vector.broadcast %259 : vector<8x1xf32> to vector<8x8xf32>
    %261 = arith.divf %257, %260 : vector<8x8xf32>
    %262 = vector.shape_cast %261 : vector<8x8xf32> to vector<8x8x1xf32>
    %263 = vector.broadcast %262 : vector<8x8x1xf32> to vector<8x8x64xf32>
    %264 = arith.mulf %247, %263 : vector<8x8x64xf32>
    %cst_34 = arith.constant dense<0.000000e+00> : vector<8x64xf32>
    %265 = vector.multi_reduction <add>, %264, %cst_34 [1] : vector<8x8x64xf32> to vector<8x64xf32>
    %c0_35 = arith.constant 0 : index
    %c0_36 = arith.constant 0 : index
    %266 = vector.load %arg6[%c0_35, %c0_36] : memref<1x64xf32, #tpu.memory_space<vmem>>, vector<1x64xf32>
    %267 = vector.broadcast %266 : vector<1x64xf32> to vector<8x64xf32>
    %268 = arith.mulf %265, %267 : vector<8x64xf32>
    %cst_37 = arith.constant dense<0.000000e+00> : vector<8xf32>
    %269 = vector.multi_reduction <add>, %268, %cst_37 [1] : vector<8x64xf32> to vector<8xf32>
    %270 = vector.shape_cast %269 : vector<8xf32> to vector<8x1xf32>
    %c0_38 = arith.constant 0 : index
    %c0_39 = arith.constant 0 : index
    %271 = vector.load %arg7[%c0_38, %c0_39] : memref<1x1xf32, #tpu.memory_space<vmem>>, vector<1x1xf32>
    %272 = vector.broadcast %271 : vector<1x1xf32> to vector<8x1xf32>
    %273 = arith.addf %270, %272 : vector<8x1xf32>
    %cst_40 = arith.constant 0.000000e+00 : f32
    %274 = vector.broadcast %cst_40 : f32 to vector<8x119xf32>
    %275 = tpu.concatenate %273, %261, %274 in 1 : vector<8x1xf32>, vector<8x8xf32>, vector<8x119xf32> -> vector<8x128xf32>
    %c0_41 = arith.constant 0 : index
    %c0_42 = arith.constant 0 : index
    %276 = vector.load %arg8[%c0_41, %c0_42] : memref<8x128xf32, #tpu.memory_space<vmem>>, vector<8x128xf32>
    tpu.vector_store %arg8[%c0_41, %c0_42], %275 {strides = array<i32>} : memref<8x128xf32, #tpu.memory_space<vmem>>, vector<8x128xf32>,
    return
  }
  func.func @transform_0(%arg0: i32) -> (i32, i32, i32) {
    %c0_i32 = arith.constant 0 : i32
    %c0_i32_0 = arith.constant 0 : i32
    %c0_i32_1 = arith.constant 0 : i32
    return %c0_i32, %arg0, %c0_i32_0 : i32, i32, i32
  }
  func.func @transform_1(%arg0: i32) -> (i32, i32) {
    %c0_i32 = arith.constant 0 : i32
    %c0_i32_0 = arith.constant 0 : i32
    %c0_i32_1 = arith.constant 0 : i32
    return %c0_i32, %c0_i32_0 : i32, i32
  }
  func.func @transform_2(%arg0: i32) -> (i32, i32) {
    %c0_i32 = arith.constant 0 : i32
    %c0_i32_0 = arith.constant 0 : i32
    %c0_i32_1 = arith.constant 0 : i32
    return %c0_i32, %c0_i32_0 : i32, i32
  }
  func.func @transform_3(%arg0: i32) -> (i32, i32) {
    %c0_i32 = arith.constant 0 : i32
    %c0_i32_0 = arith.constant 0 : i32
    %c0_i32_1 = arith.constant 0 : i32
    return %c0_i32, %c0_i32_0 : i32, i32
  }
  func.func @transform_4(%arg0: i32) -> (i32, i32) {
    %c0_i32 = arith.constant 0 : i32
    %c0_i32_0 = arith.constant 0 : i32
    %c0_i32_1 = arith.constant 0 : i32
    return %c0_i32, %c0_i32_0 : i32, i32
  }
  func.func @transform_5(%arg0: i32) -> (i32, i32) {
    %c0_i32 = arith.constant 0 : i32
    %c0_i32_0 = arith.constant 0 : i32
    %c0_i32_1 = arith.constant 0 : i32
    return %c0_i32, %c0_i32_0 : i32, i32
  }
  func.func @transform_6(%arg0: i32) -> (i32, i32) {
    %c0_i32 = arith.constant 0 : i32
    %c0_i32_0 = arith.constant 0 : i32
    %c0_i32_1 = arith.constant 0 : i32
    return %c0_i32, %c0_i32_0 : i32, i32
  }
  func.func @transform_7(%arg0: i32) -> (i32, i32) {
    %c0_i32 = arith.constant 0 : i32
    %c0_i32_0 = arith.constant 0 : i32
    return %arg0, %c0_i32 : i32, i32
  }
}

</mosaic_0001>

<bundles_post_ra>
// kernel: tpu_custom_call.1
= control target key start
LH: loop header
LB: loop body
LE: loop exit
PB: predicated region body
PF: predicated region fallthrough
CT: control target
= control target key end

     0   :  { %s4119_s0 = inlined_call_operand.hbm [shape: f32[8,8,16], index: 0, kind: input, shape index: {}]   ;;  %s4120_s1 = inlined_call_operand.hbm [shape: f32[16,256], index: 1, kind: input, shape index: {}]   ;;  %s4121_s2 = inlined_call_operand.vmem [shape: f32[1,256], index: 2, kind: input, shape index: {}]   ;;  %s4122_s3 = inlined_call_operand.hbm [shape: f32[64,256], index: 3, kind: input, shape index: {}]   ;;  %s4123_s4 = inlined_call_operand.vmem [shape: f32[1,64], index: 4, kind: input, shape index: {}]   ;;  %s4124_s5 = inlined_call_operand.vmem [shape: f32[1,64], index: 5, kind: input, shape index: {}]   ;;  %s4125_s6 = inlined_call_operand.<no memory space> [shape: f32[1,1], index: 6, kind: input, shape index: {}]   ;;  %s4126_s7 = inlined_call_operand.hbm [shape: f32[8,128], index: 7, kind: output, shape index: {}]  }
   0x1   :  { %v12_v0 = vstv %s4125_s6 }
   0x2   :  { %13 = vst [vmem:[#allocation2] sm:$0x1] %v12_v0 }
   0x3   :  { %14 = vsyncpa [#allocation4], 0 }
   0x4   :  { %15 = vsyncpa [#allocation7], 0 }
   0x5   :  { %16 = vsyncpa [#allocation5], 0  ;;  %s2899_s26 = smov [#allocation6]   ;;  %s2805_s30 = scalar_lea.hbm %s4120_s1, 512 }
   0x6   :  { %s34_s27 = sshll.u32 %s2899_s26, 4  ;;  %p2806_p0 = scmp.ne.s32.totalorder %s4120_s1, %s2805_s30  ;;  %s35_s27 = int_to_ptr.vmem [resolvable:$true] %s34_s27 }
   0x7   :  { %p2809_p1 = scmp.lt.u32.totalorder %s2805_s30, %s4120_s1 }
   0x9   :  { %p2811_p2 = pnand %p2809_p1, %p2806_p0 }
   0xb   :  { %2814 = shalt.err (!%p2811_p2)
}
   0xc   :  { %s2815_s6 = scalar_lea.vmem %s35_s27, 512  ;;  %p2820_p4 = scmp.lt.s32.totalorder %s35_s27, %s35_s27 }
   0xd   :  { %p2816_p3 = scmp.ne.s32.totalorder %s35_s27, %s2815_s6  ;;  %p2821_p5 = scmp.lt.s32.totalorder %s2815_s6, %s2815_s6 }
   0xf   :  { %p2822_p6 = por %p2821_p5, %p2820_p4 }
  0x11   :  { %p2823_p7 = pnand %p2822_p6, %p2816_p3 }
  0x13   :  { %2826 = shalt.err (!%p2823_p7)
}
  0x14   :  { %s2900_s12 = smov 256   ;;  %s2901_s13 = smov 16  }
  0x15   :  { %40 = dma.hbm_to_vmem [thread:$0]  %s4120_s1, 512, %s35_s27, [#allocation7], %s2900_s12, %s2900_s12, %s2901_s13  }
  0x16   :  { %s2902_s16 = smov [#allocation3]   ;;  %s2827_s20 = scalar_lea.hbm %s4119_s0, 1024 }
  0x17   :  { %s22_s17 = sshll.u32 %s2902_s16, 4  ;;  %p2828_p8 = scmp.ne.s32.totalorder %s4119_s0, %s2827_s20  ;;  %s23_s17 = int_to_ptr.vmem [resolvable:$true] %s22_s17 }
  0x18   :  { %p2831_p9 = scmp.lt.u32.totalorder %s2827_s20, %s4119_s0 }
  0x1a   :  { %p2833_p10 = pnand %p2831_p9, %p2828_p8 }
  0x1c   :  { %2836 = shalt.err (!%p2833_p10)
}
  0x1d   :  { %s2837_s25 = scalar_lea.vmem %s23_s17, 1024  ;;  %p2842_p12 = scmp.lt.s32.totalorder %s23_s17, %s23_s17 }
  0x1e   :  { %p2838_p11 = scmp.ne.s32.totalorder %s23_s17, %s2837_s25  ;;  %p2843_p13 = scmp.lt.s32.totalorder %s2837_s25, %s2837_s25 }
  0x20   :  { %p2844_p0 = por %p2843_p13, %p2842_p12 }
  0x22   :  { %p2845_p1 = pnand %p2844_p0, %p2838_p11 }
  0x24   :  { %2848 = shalt.err (!%p2845_p1)
}
  0x25   :  { %s2903_s1 = smov 128   ;;  %s2904_s26 = smov 8  }
  0x26   :  { %28 = dma.hbm_to_vmem [thread:$0]  %s4119_s0, 1024, %s23_s17, [#allocation4], %s2903_s1, %s2903_s1, %s2904_s26  }
  0x27   :  { %s2905_s29 = smov [#allocation8]   ;;  %s2849_s10 = scalar_lea.hbm %s4122_s3, 2048 }
  0x28   :  { %s48_s30 = sshll.u32 %s2905_s29, 4  ;;  %p2850_p2 = scmp.ne.s32.totalorder %s4122_s3, %s2849_s10  ;;  %s49_s30 = int_to_ptr.vmem [resolvable:$true] %s48_s30 }
  0x29   :  { %p2853_p3 = scmp.lt.u32.totalorder %s2849_s10, %s4122_s3 }
  0x2b   :  { %p2855_p4 = pnand %p2853_p3, %p2850_p2 }
  0x2d   :  { %2858 = shalt.err (!%p2855_p4)
}
  0x2e   :  { %s2859_s16 = scalar_lea.vmem %s49_s30, 2048  ;;  %p2864_p6 = scmp.lt.s32.totalorder %s49_s30, %s49_s30 }
  0x2f   :  { %p2860_p5 = scmp.ne.s32.totalorder %s49_s30, %s2859_s16  ;;  %p2865_p7 = scmp.lt.s32.totalorder %s2859_s16, %s2859_s16 }
  0x31   :  { %p2866_p8 = por %p2865_p7, %p2864_p6 }
  0x33   :  { %p2867_p9 = pnand %p2866_p8, %p2860_p5 }
  0x35   :  { %2870 = shalt.err (!%p2867_p9)
}
  0x36   :  { %54 = dma.hbm_to_vmem [thread:$0]  %s4122_s3, 2048, %s49_s30, [#allocation7], %s2900_s12, %s2900_s12, %s2901_s13  }
  0x37   :  { %2893 = dma.done.wait [#allocation4], 1024  }
  0x38   :  { %2894 = vsyncadd [#allocation4], 4294966272 }
  0x39   :  { %2895 = dma.done.wait [#allocation7], 2560  }
  0x3a   :  { %2896 = vsyncadd [#allocation7], 4294964736  ;;  %v4127_v1 = vmov 0.0   ;;  %v79_v2 = vld [vmem:[#allocation6 + $0x8] sm:$0xff]  ;;  %v81_v3 = vld [vmem:[#allocation6 + $0x18] sm:$0xff]  ;;  %vm94_vm0 = vcmask 130048   ;;  %v84_v40 = vlaneseq }
  0x3b   :  { %183 = vmatprep.mubr.f32.mxu0 %v4127_v1  ;;  %351 = vmatprep.mubr.f32.mxu1 %v4127_v1  ;;  %v78_v4 = vld [vmem:[#allocation6] sm:$0xff]  ;;  %v2531_v5 = vpack.c.bf16 %v81_v3, %v79_v2  ;;  %v80_v6 = vld [vmem:[#allocation6 + $0x10] sm:$0xff]  ;;  %v233_v8 = vld [vmem:[#allocation8 + $0x8] sm:$0xff]  ;;  %vm283_vm3 = vcmask 523264   ;;  %vm1811_vm4 = vcmask 1040384   ;;  %vm1820_vm5 = vcmask 1041408  }
  0x3c   :  { %v2533_v7 = vpack.c.bf16 %v80_v6, %v78_v4  ;;  %v235_v9 = vld [vmem:[#allocation8 + $0x18] sm:$0xff]  ;;  %v232_v10 = vld [vmem:[#allocation8] sm:$0xff]  ;;  %v234_v11 = vld [vmem:[#allocation8 + $0x10] sm:$0xff]  ;;  %v3058_v41 = vshrl.u32 %v84_v40, 7  ;;  %v3073_v52 = vand.u32 127, %v84_v40  ;;  %vm1829_vm6 = vcmask 1042432  }
  0x3d   :  { %2532 = vmatprep.subr.bf16.mxu0 %v2531_v5  ;;  %v70_v12 = vld [vmem:[#allocation3] sm:$0xff]  ;;  %v2998_v13 = vpack.c.bf16 %v235_v9, %v233_v8  ;;  %v3000_v14 = vpack.c.bf16 %v234_v11, %v232_v10  ;;  %v237_v15 = vld [vmem:[#allocation8 + $0x28] sm:$0xff]  ;;  %v239_v16 = vld [vmem:[#allocation8 + $0x38] sm:$0xff]  ;;  %vm1838_vm7 = vcmask 1043456   ;;  %vm1847_vm8 = vcmask 1044480  }
  0x3e   :  { %2534 = vmatpush1.bf16.msra.mxu0 %v2533_v7  ;;  %v3002_v17 = vpack.c.bf16 %v239_v16, %v237_v15  ;;  %v236_v18 = vld [vmem:[#allocation8 + $0x20] sm:$0xff]  ;;  %v238_v19 = vld [vmem:[#allocation8 + $0x30] sm:$0xff]  ;;  %v241_v20 = vld [vmem:[#allocation8 + $0x48] sm:$0xff]  ;;  %4154 = vst [vmem:[#allocation13_spill] sm:$0xff] %v3058_v41  ;;  %v3061_v42 = vsub.s32 0, %v3058_v41  ;;  %v3067_v45 = vsub.s32 1, %v3058_v41 }
  0x3f   :  { %2536 = vmatprep.subr.bf16.mxu1 %v2998_v13  ;;  %v243_v21 = vld [vmem:[#allocation8 + $0x58] sm:$0xff]  ;;  %2568 = vmatprep.subr.bf16.mxu0 %v2998_v13  ;;  %v3008_v22 = vpack.c.bf16 %v238_v19, %v236_v18  ;;  %v71_v23 = vld [vmem:[#allocation3 + $0x8] sm:$0xff]  ;;  %v240_v25 = vld [vmem:[#allocation8 + $0x40] sm:$0xff]  ;;  %4156 = vst [vmem:[#allocation15_spill] sm:$0xff] %v3073_v52  ;;  %v250_v57 = vadd.s32 128, %v3073_v52  ;;  %v255_v60 = vand.u32 63, %v3073_v52 }
  0x40   :  { %2538 = vmatpush1.bf16.msra.mxu1 %v3000_v14  ;;  %v3012_v24 = vpack.c.bf16 %v243_v21, %v241_v20  ;;  %v242_v26 = vld [vmem:[#allocation8 + $0x50] sm:$0xff]  ;;  %v245_v27 = vld [vmem:[#allocation8 + $0x68] sm:$0xff]  ;;  %v247_v28 = vld [vmem:[#allocation8 + $0x78] sm:$0xff]  ;;  %4155 = vst [vmem:[#allocation14_spill] sm:$0xff] %v3067_v45  ;;  %vm1856_vm9 = vcmask 1045504   ;;  %vm1865_vm10 = vcmask 1046528  }
  0x41   :  { %2497 = vmatmul.mubr.msk.f32.vlgmr.msra.gmra.mrb[0].mxu0 %vm94_vm0, %v70_v12  ;;  %2540 = vmatprep.subr.bf16.mxu1 %v3002_v17  ;;  %v3018_v29 = vpack.c.bf16 %v242_v26, %v240_v25  ;;  %v72_v30 = vld [vmem:[#allocation3 + $0x10] sm:$0xff]  ;;  %v3022_v31 = vpack.c.bf16 %v247_v28, %v245_v27  ;;  %v244_v32 = vld [vmem:[#allocation8 + $0x60] sm:$0xff]  ;;  %v73_v35 = vld [vmem:[#allocation3 + $0x18] sm:$0xff]  ;;  %v262_v63 = vand.u32 63, %v250_v57  ;;  %vm3087_vm1 = vcmp.lt.s32.totalorder %v255_v60, 32 }
  0x42   :  { %189 = vmatprep.mubr.f32.mxu0 %v4127_v1  ;;  %2570 = vmatpush1.bf16.msra.mxu0 %v3000_v14  ;;  %v246_v33 = vld [vmem:[#allocation8 + $0x70] sm:$0xff]  ;;  %v74_v36 = vld [vmem:[#allocation3 + $0x20] sm:$0xff]  ;;  %v75_v37 = vld [vmem:[#allocation3 + $0x28] sm:$0xff]  ;;  %vm1978_vm11 = vcmask 261120   ;;  %vm2066_vm12 = vcmask 1041409   ;;  %vm2068_vm13 = vcmask 1042434  }
  0x43   :  { %2572 = vmatprep.subr.bf16.mxu0 %v3002_v17  ;;  %v3028_v34 = vpack.c.bf16 %v246_v33, %v244_v32  ;;  %v76_v38 = vld [vmem:[#allocation3 + $0x30] sm:$0xff]  ;;  %v77_v39 = vld [vmem:[#allocation3 + $0x38] sm:$0xff]  ;;  %vm3093_vm2 = vcmp.lt.s32.totalorder %v262_v63, 32  ;;  %vm2070_vm14 = vcmask 1043459   ;;  %vm2072_vm15 = vcmask 1044484  }
  0x44   :  { %2542 = vmatpush1.bf16.msra.mxu1 %v3008_v22  ;;  %v82_v43 = vld [vmem:[%s4121_s2] sm:$0x3]  ;;  %s2907_s2 = smov 64  }
  0x45   :  { %2498 = vmatmul.mubr.msk.f32.gmra.mrb[2].mxu0 %vm94_vm0, %v71_v23  ;;  %2544 = vmatprep.subr.bf16.mxu1 %v3012_v24  ;;  %v87_v47 = vrot.slane %v82_v43, %v3061_v42  ;;  %v91_v48 = vrot.slane %v82_v43, %v3067_v45 }
  0x46   :  { %195 = vmatprep.mubr.f32.mxu0 %v4127_v1  ;;  %2574 = vmatpush1.bf16.msra.mxu0 %v3008_v22 }
  0x47   :  { %2576 = vmatprep.subr.bf16.mxu0 %v3012_v24 }
  0x48   :  { %2546 = vmatpush1.bf16.msra.mxu1 %v3018_v29 }
  0x49   :  { %2499 = vmatmul.mubr.msk.f32.gmra.mrb[4].mxu0 %vm94_vm0, %v72_v30  ;;  %2548 = vmatprep.subr.bf16.mxu1 %v3022_v31 }
  0x4a   :  { %201 = vmatprep.mubr.f32.mxu0 %v4127_v1  ;;  %2578 = vmatpush1.bf16.msra.mxu0 %v3018_v29 }
  0x4b   :  { %2580 = vmatprep.subr.bf16.mxu0 %v3022_v31 }
  0x4c   :  { %2550 = vmatpush1.bf16.msra.mxu1 %v3028_v34 }
  0x4d   :  { %2500 = vmatmul.mubr.msk.f32.gmra.mrb[6].mxu0 %vm94_vm0, %v73_v35  ;;  %2552 = vmatprep.subr.bf16.mxu1 %v2998_v13 }
  0x4e   :  { %207 = vmatprep.mubr.f32.mxu0 %v4127_v1  ;;  %2582 = vmatpush1.bf16.msra.mxu0 %v3028_v34 }
  0x4f   :  { %352 = vmatmul.mubr.f32.vlgmr.msra.gmra.mrb[0].mxu1 %v4127_v1  ;;  %2600 = vmatprep.subr.bf16.mxu0 %v2998_v13 }
  0x50   :  { %2554 = vmatpush1.bf16.msra.mxu1 %v3000_v14  ;;  %457 = vmatprep.mubr.f32.mxu1 %v4127_v1 }
  0x51   :  { %2501 = vmatmul.mubr.msk.f32.gmra.mrb[8].mxu0 %vm94_vm0, %v74_v36  ;;  %2556 = vmatprep.subr.bf16.mxu1 %v3002_v17 }
  0x52   :  { %213 = vmatprep.mubr.f32.mxu0 %v4127_v1 }
  0x54   :  { %2558 = vmatpush1.bf16.msra.mxu1 %v3008_v22 }
  0x55   :  { %2502 = vmatmul.mubr.msk.f32.gmra.mrb[10].mxu0 %vm94_vm0, %v75_v37  ;;  %2560 = vmatprep.subr.bf16.mxu1 %v3012_v24 }
  0x56   :  { %219 = vmatprep.mubr.f32.mxu0 %v4127_v1 }
  0x58   :  { %2562 = vmatpush1.bf16.msra.mxu1 %v3018_v29 }
  0x59   :  { %2503 = vmatmul.mubr.msk.f32.gmra.mrb[12].mxu0 %vm94_vm0, %v76_v38  ;;  %2564 = vmatprep.subr.bf16.mxu1 %v3022_v31 }
  0x5a   :  { %225 = vmatprep.mubr.f32.mxu0 %v4127_v1 }
  0x5c   :  { %2566 = vmatpush1.bf16.msra.mxu1 %v3028_v34 }
  0x5d   :  { %2504 = vmatmul.mubr.msk.f32.gmra.mrb[14].mxu0 %vm94_vm0, %v77_v39  ;;  %2584 = vmatprep.subr.bf16.mxu1 %v2998_v13  ;;  %vm2074_vm0 = vcmask 1045509  }
  0x5e   :  { %563 = vmatprep.mubr.f32.mxu0 %v4127_v1 }
 0x114   :  { %v185_v44 = vpop.f32.mrb[0].mxu0 }
 0x115   :  { %v187_v46 = vpop.f32.mrb[1].mxu0  ;;  %v3155_v39 = vadd.f32 %v185_v44, %v87_v47 }
 0x118   :  { %v191_v49 = vpop.f32.mrb[2].mxu0 }
 0x119   :  { %v3071_v50 = vadd.f32 %v191_v49, %v87_v47  ;;  %v193_v51 = vpop.f32.mrb[3].mxu0  ;;  %v3159_v49 = vadd.f32 %v187_v46, %v91_v48 }
 0x11a   :  { %v3075_v53 = vadd.f32 %v193_v51, %v91_v48 }
 0x11c   :  { %v197_v54 = vpop.f32.mrb[4].mxu0 }
 0x11d   :  { %v3077_v55 = vadd.f32 %v197_v54, %v87_v47  ;;  %v199_v56 = vpop.f32.mrb[5].mxu0 }
 0x11e   :  { %v3080_v58 = vadd.f32 %v199_v56, %v91_v48 }
 0x120   :  { %v203_v59 = vpop.f32.mrb[6].mxu0 }
 0x121   :  { %v3083_v61 = vadd.f32 %v203_v59, %v87_v47  ;;  %v205_v62 = vpop.f32.mrb[7].mxu0 }
 0x122   :  { %v3085_v0 = vadd.f32 %v205_v62, %v91_v48  ;;  %v353_v2 = vpop.f32.mrb[0].mxu1 }
 0x123   :  { %v355_v5 = vpop.f32.mrb[1].mxu1 }
 0x124   :  { %v209_v3 = vpop.f32.mrb[8].mxu0 }
 0x125   :  { %v3091_v6 = vadd.f32 %v209_v3, %v87_v47  ;;  %v211_v7 = vpop.f32.mrb[9].mxu0 }
 0x126   :  { %v3097_v9 = vadd.f32 %v211_v7, %v91_v48 }
 0x128   :  { %v215_v12 = vpop.f32.mrb[10].mxu0 }
 0x129   :  { %v3115_v18 = vadd.f32 %v215_v12, %v87_v47  ;;  %v217_v19 = vpop.f32.mrb[11].mxu0 }
 0x12a   :  { %v3117_v20 = vadd.f32 %v217_v19, %v91_v48 }
 0x12b   :  { %v494_v21 = vsel %vm3087_vm1, %v3077_v55, %v3115_v18 }
 0x12c   :  { %v221_v25 = vpop.f32.mrb[12].mxu0  ;;  %v495_v26 = vsel %vm3093_vm2, %v3080_v58, %v3117_v20 }
 0x12d   :  { %v3135_v28 = vadd.f32 %v221_v25, %v87_v47  ;;  %v223_v30 = vpop.f32.mrb[13].mxu0 }
 0x12e   :  { %v3137_v32 = vadd.f32 %v223_v30, %v91_v48 }
 0x12f   :  { %v388_v33 = vsel %vm3087_vm1, %v3071_v50, %v3135_v28 }
 0x130   :  { %v227_v36 = vpop.f32.mrb[14].mxu0  ;;  %v389_v37 = vsel %vm3093_vm2, %v3075_v53, %v3137_v32 }
 0x131   :  { %v3157_v40 = vadd.f32 %v227_v36, %v87_v47  ;;  %v229_v43 = vpop.f32.mrb[15].mxu0 }
 0x132   :  { %v3161_v51 = vadd.f32 %v229_v43, %v91_v48 }
 0x133   :  { %v281_v54 = vsel %vm3087_vm1, %v3155_v39, %v3157_v40 }
 0x134   :  { %v354_v57 = vadd.f32 %v353_v2, %v281_v54  ;;  %v282_v44 = vsel %vm3093_vm2, %v3159_v49, %v3161_v51 }
 0x135   :  { %v356_v47 = vadd.f32 %v355_v5, %v282_v44 }
 0x136   :  { %v2505_v59 = vmul.f32 -1.442695, %v354_v57 }
 0x137   :  { %2677 = vtanh.f32 %v356_v47  ;;  %v2506_v25 = vmul.f32 -1.442695, %v356_v47 }
 0x138   :  { %2679 = vpow2.f32 %v2505_v59 }
 0x141   :  { %v2678_v48 = vpop.eup %2677 }
 0x142   :  { %373 = vrot.lane.b32.xlu0 %v2678_v48, %s2907_s2  ;;  %v2680_v60 = vpop.eup %2679 }
 0x143   :  { %v364_v62 = vadd.f32 1.0, %v2680_v60 }
 0x145   :  { %2681 = vrcp.f32 %v364_v62 }
 0x14f   :  { %v2682_v63 = vpop.eup %2681 }
 0x150   :  { %v371_v7 = vmul.f32 0.0, %v2682_v63 }
 0x1b4   :  { %v374_v2 = vpop.permute.xlu0 %373 }
 0x1b5   :  { %v376_v3 = vmul.f32 %v2682_v63, %v374_v2 }
 0x1b7   :  { %378 = vrot.lane.b32.xlu0 %v376_v3, %s2907_s2 }
 0x229   :  { %v379_v12 = vpop.permute.xlu0 %378 }
 0x22a   :  { %v381_v19 = vadd.f32 %v379_v12, %v371_v7 }
 0x22c   :  { %2683 = vtanh.f32 %v381_v19 }
 0x22d   :  { %2685 = vpow2.f32 %v2506_v25 }
 0x236   :  { %v2684_v5 = vpop.eup %2683 }
 0x237   :  { %384 = vrot.lane.b32.xlu1 %v2684_v5, %s2907_s2  ;;  %v2686_v30 = vpop.eup %2685 }
 0x238   :  { %v365_v36 = vadd.f32 1.0, %v2686_v30 }
 0x23a   :  { %2687 = vrcp.f32 %v365_v36 }
 0x244   :  { %v2688_v43 = vpop.eup %2687 }
 0x2a9   :  { %v385_v54 = vpop.permute.xlu1 %384 }
 0x2aa   :  { %v387_v57 = vmul.f32 %v2688_v43, %v385_v54  ;;  %v2908_v43 = vmov 1966171168  }
 0x2ab   :  { %v1132_v54 = vunpack.c.l.s4 %v2908_v43 }
 0x2ac   :  { %2507 = vmatmul.mubr.msk.f32.vlgmr.msra.gmra.mrb[2].mxu1 %vm283_vm3, %v387_v57 }
 0x2ad   :  { %2586 = vmatpush1.bf16.msra.mxu1 %v3000_v14  ;;  %669 = vmatprep.mubr.f32.mxu1 %v4127_v1 }
 0x2ae   :  { %2588 = vmatprep.subr.bf16.mxu1 %v3002_v17 }
 0x2b1   :  { %2590 = vmatpush1.bf16.msra.mxu1 %v3008_v22 }
 0x2b2   :  { %2592 = vmatprep.subr.bf16.mxu1 %v3012_v24 }
 0x2b5   :  { %2594 = vmatpush1.bf16.msra.mxu1 %v3018_v29 }
 0x2b6   :  { %2596 = vmatprep.subr.bf16.mxu1 %v3022_v31 }
 0x2b9   :  { %2598 = vmatpush1.bf16.msra.mxu1 %v3028_v34 }
 0x2ba   :  { %2616 = vmatprep.subr.bf16.mxu1 %v2998_v13 }
 0x37f   :  { %v459_v44 = vpop.f32.mrb[2].mxu1 }
 0x380   :  { %v460_v47 = vadd.f32 %v459_v44, %v388_v33  ;;  %v461_v48 = vpop.f32.mrb[3].mxu1 }
 0x381   :  { %v462_v59 = vadd.f32 %v461_v48, %v389_v37 }
 0x382   :  { %v2508_v62 = vmul.f32 -1.442695, %v460_v47  ;;  %v1133_v47 = vunpack.c.0.s8 %v1132_v54 }
 0x383   :  { %2689 = vtanh.f32 %v462_v59  ;;  %v2509_v37 = vmul.f32 -1.442695, %v462_v59 }
 0x384   :  { %2691 = vpow2.f32 %v2508_v62  ;;  %v3199_v48 = vsub.s32 %v1133_v47, %v3058_v41 }
 0x38d   :  { %v2690_v60 = vpop.eup %2689 }
 0x38e   :  { %479 = vrot.lane.b32.xlu1 %v2690_v60, %s2907_s2  ;;  %v2692_v63 = vpop.eup %2691  ;;  %v1137_v60 = vrot.slane %v387_v57, %v3199_v48 }
 0x38f   :  { %v470_v2 = vadd.f32 1.0, %v2692_v63 }
 0x391   :  { %2693 = vrcp.f32 %v470_v2  ;;  %v1145_v2 = vcombine.high %v1137_v60, %v1137_v60 }
 0x39b   :  { %v2694_v3 = vpop.eup %2693 }
 0x39c   :  { %v477_v5 = vmul.f32 %v2694_v3, %v381_v19  ;;  %v1130_v19 = vcombine.high %v387_v57, %v387_v57 }
 0x39e   :  { %v1144_v63 = vrot.slane %v1130_v19, %v3199_v48 }
 0x3a0   :  { %v3217_v43 = vrot.slane %v1144_v63, %v3199_v48 }
 0x400   :  { %v480_v7 = vpop.permute.xlu1 %479 }
 0x401   :  { %v482_v12 = vmul.f32 %v2694_v3, %v480_v7 }
 0x403   :  { %484 = vrot.lane.b32.xlu0 %v482_v12, %s2907_s2 }
 0x475   :  { %v485_v25 = vpop.permute.xlu0 %484 }
 0x476   :  { %v3194_v30 = vadd.f32 %v485_v25, %v477_v5  ;;  %v1146_v5 = vcombine.high %v1144_v63, %v1144_v63  ;;  %v3206_v25 = vrot.slane %v1137_v60, %v3199_v48 }
 0x478   :  { %2695 = vtanh.f32 %v3194_v30  ;;  %v3222_v60 = vrot.slane %v1146_v5, %v3199_v48 }
 0x479   :  { %2697 = vpow2.f32 %v2509_v37 }
 0x47a   :  { %4161 = vst [vmem:[#allocation16_spill] sm:$0xff] %v3222_v60  ;;  %v3294_v35 = vcombine.high %v3222_v60, %v3222_v60 }
 0x47c   :  { %4166 = vst [vmem:[#allocation21_spill] sm:$0xff] %v3294_v35 }
 0x482   :  { %v2696_v33 = vpop.eup %2695 }
 0x483   :  { %490 = vrot.lane.b32.xlu1 %v2696_v33, %s2907_s2  ;;  %v2698_v36 = vpop.eup %2697  ;;  %v3209_v33 = vrot.slane %v1145_v2, %v3199_v48 }
 0x484   :  { %v471_v44 = vadd.f32 1.0, %v2698_v36 }
 0x485   :  { %v3234_v63 = vcombine.high %v3209_v33, %v3209_v33 }
 0x486   :  { %2699 = vrcp.f32 %v471_v44 }
 0x490   :  { %v2700_v62 = vpop.eup %2699 }
 0x4f5   :  { %v491_v3 = vpop.permute.xlu1 %490 }
 0x4f6   :  { %v493_v7 = vmul.f32 %v2700_v62, %v491_v3  ;;  %v3226_v62 = vcombine.high %v3206_v25, %v3206_v25 }
 0x4f8   :  { %v1187_v59 = vcombine.high %v493_v7, %v493_v7  ;;  %v1194_v12 = vrot.slane %v493_v7, %v3199_v48  ;;  %2510 = vmatmul.mubr.msk.f32.vlgmr.msra.gmra.mrb[16].mxu0 %vm283_vm3, %v493_v7 }
 0x4f9   :  { %2602 = vmatpush1.bf16.msra.mxu0 %v3000_v14  ;;  %775 = vmatprep.mubr.f32.mxu0 %v4127_v1 }
 0x4fa   :  { %v1201_v57 = vrot.slane %v1187_v59, %v3199_v48  ;;  %v1202_v37 = vcombine.high %v1194_v12, %v1194_v12  ;;  %v1210_v36 = vrot.slane %v1194_v12, %v3199_v48  ;;  %2604 = vmatprep.subr.bf16.mxu0 %v3002_v17 }
 0x4fc   :  { %v1203_v54 = vcombine.high %v1201_v57, %v1201_v57  ;;  %v1217_v44 = vrot.slane %v1201_v57, %v3199_v48  ;;  %v1224_v47 = vrot.slane %v1202_v37, %v3199_v48  ;;  %v1232_v19 = vcombine.high %v1210_v36, %v1210_v36 }
 0x4fd   :  { %v3229_v2 = vrot.slane %v1210_v36, %v3061_v42  ;;  %2606 = vmatpush1.bf16.msra.mxu0 %v3008_v22  ;;  %v3254_v36 = vcombine.high %v3217_v43, %v3217_v43 }
 0x4fe   :  { %v1231_v3 = vrot.slane %v1203_v54, %v3199_v48  ;;  %v1233_v7 = vcombine.high %v1217_v44, %v1217_v44  ;;  %v1234_v59 = vcombine.high %v1224_v47, %v1224_v47  ;;  %v3238_v12 = vrot.slane %v1224_v47, %v3061_v42  ;;  %2608 = vmatprep.subr.bf16.mxu0 %v3012_v24 }
 0x4ff   :  { %v3242_v5 = vrot.slane %v1232_v19, %v3061_v42  ;;  %v3245_v57 = vrot.slane %v1217_v44, %v3061_v42  ;;  %v3250_v37 = vsel %vm1811_vm4, %v3206_v25, %v3229_v2 }
 0x500   :  { %v1235_v54 = vcombine.high %v1231_v3, %v1231_v3  ;;  %v3259_v47 = vsel %vm1811_vm4, %v3209_v33, %v3238_v12  ;;  %v3262_v19 = vrot.slane %v1234_v59, %v3061_v42  ;;  %v3265_v44 = vrot.slane %v1233_v7, %v3061_v42 }
 0x501   :  { %4162 = vst [vmem:[#allocation17_spill] sm:$0xff] %v3245_v57  ;;  %v3270_v46 = vsel %vm1811_vm4, %v3226_v62, %v3242_v5  ;;  %v3275_v56 = vsel %vm1811_vm4, %v3217_v43, %v3245_v57  ;;  %2610 = vmatpush1.bf16.msra.mxu0 %v3018_v29  ;;  %v3279_v38 = vrot.slane %v1231_v3, %v3061_v42 }
 0x502   :  { %4163 = vst [vmem:[#allocation18_spill] sm:$0xff] %v3262_v19  ;;  %4164 = vst [vmem:[#allocation19_spill] sm:$0xff] %v3265_v44  ;;  %2612 = vmatprep.subr.bf16.mxu0 %v3022_v31  ;;  %v3285_v7 = vsel %vm1811_vm4, %v3234_v63, %v3262_v19  ;;  %v3290_v59 = vsel %vm1811_vm4, %v3254_v36, %v3265_v44  ;;  %v3297_v27 = vrot.slane %v1235_v54, %v3061_v42 }
 0x503   :  { %4165 = vst [vmem:[#allocation20_spill] sm:$0xff] %v3279_v38  ;;  %v3302_v3 = vsel %vm1811_vm4, %v3222_v60, %v3279_v38 }
 0x504   :  { %4167 = vst [vmem:[#allocation22_spill] sm:$0xff] %v3297_v27  ;;  %v3307_v23 = vsel %vm1811_vm4, %v3294_v35, %v3297_v27 }
 0x505   :  { %2614 = vmatpush1.bf16.msra.mxu0 %v3028_v34 }
 0x506   :  { %2632 = vmatprep.subr.bf16.mxu0 %v2998_v13 }
 0x5cb   :  { %v565_v16 = vpop.f32.mrb[16].mxu0 }
 0x5cc   :  { %v566_v54 = vadd.f32 %v565_v16, %v494_v21  ;;  %v567_v11 = vpop.f32.mrb[17].mxu0 }
 0x5cd   :  { %v568_v15 = vadd.f32 %v567_v11, %v495_v26 }
 0x5ce   :  { %v2511_v1 = vmul.f32 -1.442695, %v566_v54 }
 0x5cf   :  { %2701 = vtanh.f32 %v568_v15 }
 0x5d0   :  { %2703 = vpow2.f32 %v2511_v1 }
 0x5d9   :  { %v2702_v10 = vpop.eup %2701 }
 0x5da   :  { %585 = vrot.lane.b32.xlu0 %v2702_v10, %s2907_s2  ;;  %v2704_v45 = vpop.eup %2703  ;;  %v2512_v10 = vmul.f32 -1.442695, %v568_v15 }
 0x5db   :  { %v576_v52 = vadd.f32 1.0, %v2704_v45 }
 0x5dd   :  { %2705 = vrcp.f32 %v576_v52 }
 0x5e7   :  { %v2706_v41 = vpop.eup %2705 }
 0x5e8   :  { %v583_v16 = vmul.f32 %v2706_v41, %v3194_v30 }
 0x64c   :  { %v586_v27 = vpop.permute.xlu0 %585 }
 0x64d   :  { %v588_v35 = vmul.f32 %v2706_v41, %v586_v27  ;;  %v4168_v41 = vmov 0.0  }
 0x64f   :  { %590 = vrot.lane.b32.xlu1 %v588_v35, %s2907_s2 }
 0x6c1   :  { %v591_v21 = vpop.permute.xlu1 %590 }
 0x6c2   :  { %v3324_v38 = vadd.f32 %v591_v21, %v583_v16 }
 0x6c4   :  { %2707 = vtanh.f32 %v3324_v38 }
 0x6c5   :  { %2709 = vpow2.f32 %v2512_v10 }
 0x6ce   :  { %v2708_v11 = vpop.eup %2707 }
 0x6cf   :  { %596 = vrot.lane.b32.xlu0 %v2708_v11, %s2907_s2  ;;  %v2710_v1 = vpop.eup %2709 }
 0x6d0   :  { %v577_v45 = vadd.f32 1.0, %v2710_v1 }
 0x6d2   :  { %2711 = vrcp.f32 %v577_v45 }
 0x6dc   :  { %v2712_v52 = vpop.eup %2711 }
 0x741   :  { %v597_v26 = vpop.permute.xlu0 %596 }
 0x742   :  { %v599_v27 = vmul.f32 %v2712_v52, %v597_v26 }
 0x744   :  { %v1236_v54 = vcombine.high %v599_v27, %v599_v27  ;;  %v1243_v35 = vrot.slane %v599_v27, %v3199_v48  ;;  %2513 = vmatmul.mubr.msk.f32.vlgmr.msra.gmra.mrb[4].mxu1 %vm283_vm3, %v599_v27 }
 0x745   :  { %2618 = vmatpush1.bf16.msra.mxu1 %v3000_v14  ;;  %881 = vmatprep.mubr.f32.mxu1 %v4168_v41 }
 0x746   :  { %v1250_v30 = vrot.slane %v1236_v54, %v3199_v48  ;;  %v1251_v16 = vcombine.high %v1243_v35, %v1243_v35  ;;  %v1259_v15 = vrot.slane %v1243_v35, %v3199_v48  ;;  %2620 = vmatprep.subr.bf16.mxu1 %v3002_v17 }
 0x748   :  { %v1252_v21 = vcombine.high %v1250_v30, %v1250_v30  ;;  %v1266_v11 = vrot.slane %v1250_v30, %v3199_v48  ;;  %v1273_v10 = vrot.slane %v1251_v16, %v3199_v48  ;;  %v1281_v1 = vcombine.high %v1259_v15, %v1259_v15 }
 0x749   :  { %v3338_v45 = vrot.slane %v1259_v15, %v3061_v42  ;;  %2622 = vmatpush1.bf16.msra.mxu1 %v3008_v22 }
 0x74a   :  { %v1280_v52 = vrot.slane %v1252_v21, %v3199_v48  ;;  %v1282_v26 = vcombine.high %v1266_v11, %v1266_v11  ;;  %v1283_v27 = vcombine.high %v1273_v10, %v1273_v10  ;;  %v3343_v54 = vrot.slane %v1273_v10, %v3061_v42  ;;  %2624 = vmatprep.subr.bf16.mxu1 %v3012_v24 }
 0x74b   :  { %v3347_v35 = vrot.slane %v1281_v1, %v3061_v42  ;;  %v3350_v30 = vrot.slane %v1266_v11, %v3061_v42  ;;  %v3355_v16 = vsel %vm1820_vm5, %v3250_v37, %v3338_v45 }
 0x74c   :  { %v1284_v15 = vcombine.high %v1280_v52, %v1280_v52  ;;  %v3358_v21 = vrot.slane %v1283_v27, %v3061_v42  ;;  %v3361_v10 = vrot.slane %v1280_v52, %v3061_v42  ;;  %v3364_v60 = vrot.slane %v1282_v26, %v3061_v42 }
 0x74d   :  { %4169 = vst [vmem:[#allocation23_spill] sm:$0xff] %v3350_v30  ;;  %v3369_v11 = vsel %vm1820_vm5, %v3259_v47, %v3343_v54  ;;  %v3374_v37 = vsel %vm1820_vm5, %v3270_v46, %v3347_v35  ;;  %v3379_v1 = vsel %vm1820_vm5, %v3275_v56, %v3350_v30  ;;  %2626 = vmatpush1.bf16.msra.mxu1 %v3018_v29 }
 0x74e   :  { %4170 = vst [vmem:[#allocation24_spill] sm:$0xff] %v3358_v21  ;;  %4171 = vst [vmem:[#allocation25_spill] sm:$0xff] %v3361_v10  ;;  %2628 = vmatprep.subr.bf16.mxu1 %v3022_v31  ;;  %v3386_v52 = vsel %vm1820_vm5, %v3285_v7, %v3358_v21  ;;  %v3391_v47 = vsel %vm1820_vm5, %v3290_v59, %v3364_v60  ;;  %v3396_v46 = vsel %vm1820_vm5, %v3302_v3, %v3361_v10 }
 0x74f   :  { %4172 = vst [vmem:[#allocation26_spill] sm:$0xff] %v3364_v60  ;;  %v3399_v56 = vrot.slane %v1284_v15, %v3061_v42  ;;  %v4174_v59 = vsel %vm3087_vm1, %v3083_v61, %v3091_v6  ;;  %v4175_v15 = vsel %vm3093_vm2, %v3085_v0, %v3097_v9 }
 0x751   :  { %4173 = vst [vmem:[#allocation27_spill] sm:$0xff] %v3399_v56  ;;  %v3404_v26 = vsel %vm1820_vm5, %v3307_v23, %v3399_v56  ;;  %2630 = vmatpush1.bf16.msra.mxu1 %v3028_v34 }
 0x752   :  { %2648 = vmatprep.subr.bf16.mxu1 %v2998_v13 }
 0x817   :  { %v671_v7 = vpop.f32.mrb[4].mxu1 }
 0x818   :  { %v672_v3 = vadd.f32 %v671_v7, %v4174_v59  ;;  %v673_v27 = vpop.f32.mrb[5].mxu1 }
 0x819   :  { %v674_v10 = vadd.f32 %v673_v27, %v4175_v15 }
 0x81a   :  { %v2514_v56 = vmul.f32 -1.442695, %v672_v3 }
 0x81b   :  { %2713 = vtanh.f32 %v674_v10  ;;  %v2515_v3 = vmul.f32 -1.442695, %v674_v10 }
 0x81c   :  { %2715 = vpow2.f32 %v2514_v56 }
 0x825   :  { %v2714_v23 = vpop.eup %2713 }
 0x826   :  { %691 = vrot.lane.b32.xlu1 %v2714_v23, %s2907_s2  ;;  %v2716_v13 = vpop.eup %2715 }
 0x827   :  { %v682_v44 = vadd.f32 1.0, %v2716_v13 }
 0x829   :  { %2717 = vrcp.f32 %v682_v44 }
 0x833   :  { %v2718_v60 = vpop.eup %2717 }
 0x834   :  { %v689_v7 = vmul.f32 %v2718_v60, %v3324_v38 }
 0x898   :  { %v692_v19 = vpop.permute.xlu1 %691 }
 0x899   :  { %v694_v21 = vmul.f32 %v2718_v60, %v692_v19 }
 0x89b   :  { %696 = vrot.lane.b32.xlu0 %v694_v21, %s2907_s2 }
 0x90d   :  { %v697_v59 = vpop.permute.xlu0 %696 }
 0x90e   :  { %v3421_v57 = vadd.f32 %v697_v59, %v689_v7 }
 0x910   :  { %2719 = vtanh.f32 %v3421_v57 }
 0x911   :  { %2721 = vpow2.f32 %v2515_v3 }
 0x91a   :  { %v2720_v27 = vpop.eup %2719 }
 0x91b   :  { %702 = vrot.lane.b32.xlu1 %v2720_v27, %s2907_s2  ;;  %v2722_v56 = vpop.eup %2721 }
 0x91c   :  { %v683_v15 = vadd.f32 1.0, %v2722_v56 }
 0x91e   :  { %2723 = vrcp.f32 %v683_v15 }
 0x928   :  { %v2724_v44 = vpop.eup %2723 }
 0x98d   :  { %v703_v23 = vpop.permute.xlu1 %702 }
 0x98e   :  { %v705_v19 = vmul.f32 %v2724_v44, %v703_v23 }
 0x990   :  { %v1285_v13 = vcombine.high %v705_v19, %v705_v19  ;;  %v1292_v21 = vrot.slane %v705_v19, %v3199_v48  ;;  %2516 = vmatmul.mubr.msk.f32.vlgmr.msra.gmra.mrb[18].mxu0 %vm283_vm3, %v705_v19 }
 0x991   :  { %2634 = vmatpush1.bf16.msra.mxu0 %v3000_v14  ;;  %987 = vmatprep.mubr.f32.mxu0 %v4168_v41 }
 0x992   :  { %v1299_v38 = vrot.slane %v1285_v13, %v3199_v48  ;;  %v1300_v60 = vcombine.high %v1292_v21, %v1292_v21  ;;  %v1308_v10 = vrot.slane %v1292_v21, %v3199_v48  ;;  %2636 = vmatprep.subr.bf16.mxu0 %v3002_v17 }
 0x994   :  { %v1301_v7 = vcombine.high %v1299_v38, %v1299_v38  ;;  %v1315_v59 = vrot.slane %v1299_v38, %v3199_v48  ;;  %v1322_v27 = vrot.slane %v1300_v60, %v3199_v48  ;;  %v1330_v3 = vcombine.high %v1308_v10, %v1308_v10 }
 0x995   :  { %v3435_v56 = vrot.slane %v1308_v10, %v3061_v42  ;;  %2638 = vmatpush1.bf16.msra.mxu0 %v3008_v22 }
 0x996   :  { %v1329_v15 = vrot.slane %v1301_v7, %v3199_v48  ;;  %v1331_v44 = vcombine.high %v1315_v59, %v1315_v59  ;;  %v1332_v23 = vcombine.high %v1322_v27, %v1322_v27  ;;  %v3440_v19 = vrot.slane %v1322_v27, %v3061_v42  ;;  %2640 = vmatprep.subr.bf16.mxu0 %v3012_v24 }
 0x997   :  { %v3444_v13 = vrot.slane %v1330_v3, %v3061_v42  ;;  %v3447_v21 = vrot.slane %v1315_v59, %v3061_v42  ;;  %v3452_v38 = vsel %vm1829_vm6, %v3355_v16, %v3435_v56 }
 0x998   :  { %v1333_v60 = vcombine.high %v1329_v15, %v1329_v15  ;;  %v3455_v10 = vrot.slane %v1332_v23, %v3061_v42  ;;  %v3458_v7 = vrot.slane %v1329_v15, %v3061_v42  ;;  %v3461_v27 = vrot.slane %v1331_v44, %v3061_v42 }
 0x999   :  { %4176 = vst [vmem:[#allocation28_spill] sm:$0xff] %v3447_v21  ;;  %2642 = vmatpush1.bf16.msra.mxu0 %v3018_v29  ;;  %v3467_v59 = vsel %vm1829_vm6, %v3369_v11, %v3440_v19  ;;  %v3472_v16 = vsel %vm1829_vm6, %v3374_v37, %v3444_v13  ;;  %v3477_v3 = vsel %vm1829_vm6, %v3379_v1, %v3447_v21 }
 0x99a   :  { %4177 = vst [vmem:[#allocation29_spill] sm:$0xff] %v3455_v10  ;;  %4178 = vst [vmem:[#allocation30_spill] sm:$0xff] %v3458_v7  ;;  %v3480_v15 = vrot.slane %v1333_v60, %v3061_v42  ;;  %2644 = vmatprep.subr.bf16.mxu0 %v3022_v31  ;;  %v3486_v11 = vsel %vm1829_vm6, %v3386_v52, %v3455_v10  ;;  %v3491_v37 = vsel %vm1829_vm6, %v3391_v47, %v3461_v27 }
 0x99b   :  { %4179 = vst [vmem:[#allocation31_spill] sm:$0xff] %v3461_v27  ;;  %v3496_v1 = vsel %vm1829_vm6, %v3396_v46, %v3458_v7  ;;  %v4181_v52 = vsel %vm3087_vm1, %v3091_v6, %v3083_v61  ;;  %v4182_v46 = vsel %vm3093_vm2, %v3097_v9, %v3085_v0 }
 0x99c   :  { %4180 = vst [vmem:[#allocation32_spill] sm:$0xff] %v3480_v15  ;;  %v3501_v44 = vsel %vm1829_vm6, %v3404_v26, %v3480_v15 }
 0x99d   :  { %2646 = vmatpush1.bf16.msra.mxu0 %v3028_v34 }
 0xa63   :  { %v777_v23 = vpop.f32.mrb[18].mxu0 }
 0xa64   :  { %v778_v47 = vadd.f32 %v777_v23, %v4181_v52  ;;  %v779_v60 = vpop.f32.mrb[19].mxu0 }
 0xa65   :  { %v780_v7 = vadd.f32 %v779_v60, %v4182_v46 }
 0xa66   :  { %v2517_v26 = vmul.f32 -1.442695, %v778_v47 }
 0xa67   :  { %2725 = vtanh.f32 %v780_v7  ;;  %v2518_v9 = vmul.f32 -1.442695, %v780_v7 }
 0xa68   :  { %2727 = vpow2.f32 %v2517_v26 }
 0xa71   :  { %v2726_v27 = vpop.eup %2725 }
 0xa72   :  { %797 = vrot.lane.b32.xlu0 %v2726_v27, %s2907_s2  ;;  %v2728_v15 = vpop.eup %2727 }
 0xa73   :  { %v788_v10 = vadd.f32 1.0, %v2728_v15 }
 0xa75   :  { %2729 = vrcp.f32 %v788_v10 }
 0xa7f   :  { %v2730_v30 = vpop.eup %2729 }
 0xa80   :  { %v795_v6 = vmul.f32 %v2730_v30, %v3421_v57 }
 0xae4   :  { %v798_v21 = vpop.permute.xlu0 %797 }
 0xae5   :  { %v800_v61 = vmul.f32 %v2730_v30, %v798_v21 }
 0xae7   :  { %802 = vrot.lane.b32.xlu1 %v800_v61, %s2907_s2 }
 0xb59   :  { %v803_v23 = vpop.permute.xlu1 %802 }
 0xb5a   :  { %v3517_v52 = vadd.f32 %v803_v23, %v795_v6 }
 0xb5c   :  { %2731 = vtanh.f32 %v3517_v52 }
 0xb5d   :  { %2733 = vpow2.f32 %v2518_v9 }
 0xb66   :  { %v2732_v0 = vpop.eup %2731 }
 0xb67   :  { %808 = vrot.lane.b32.xlu0 %v2732_v0, %s2907_s2  ;;  %v2734_v27 = vpop.eup %2733 }
 0xb68   :  { %v789_v15 = vadd.f32 1.0, %v2734_v27 }
 0xb6a   :  { %2735 = vrcp.f32 %v789_v15 }
 0xb74   :  { %v2736_v10 = vpop.eup %2735 }
 0xbd9   :  { %v809_v47 = vpop.permute.xlu0 %808 }
 0xbda   :  { %v811_v21 = vmul.f32 %v2736_v10, %v809_v47 }
 0xbdc   :  { %v1334_v60 = vcombine.high %v811_v21, %v811_v21  ;;  %v1341_v46 = vrot.slane %v811_v21, %v3199_v48  ;;  %2519 = vmatmul.mubr.msk.f32.vlgmr.msra.gmra.mrb[6].mxu1 %vm283_vm3, %v811_v21 }
 0xbdd   :  { %2650 = vmatpush1.bf16.msra.mxu1 %v3000_v14  ;;  %1093 = vmatprep.mubr.f32.mxu1 %v4168_v41 }
 0xbde   :  { %v1348_v57 = vrot.slane %v1334_v60, %v3199_v48  ;;  %v1349_v30 = vcombine.high %v1341_v46, %v1341_v46  ;;  %v1357_v7 = vrot.slane %v1341_v46, %v3199_v48  ;;  %2652 = vmatprep.subr.bf16.mxu1 %v3002_v17 }
 0xbe0   :  { %v1350_v26 = vcombine.high %v1348_v57, %v1348_v57  ;;  %v1364_v61 = vrot.slane %v1348_v57, %v3199_v48  ;;  %v1371_v6 = vrot.slane %v1349_v30, %v3199_v48  ;;  %v1379_v23 = vcombine.high %v1357_v7, %v1357_v7 }
 0xbe1   :  { %v3531_v0 = vrot.slane %v1357_v7, %v3061_v42  ;;  %2654 = vmatpush1.bf16.msra.mxu1 %v3008_v22 }
 0xbe2   :  { %v1378_v14 = vrot.slane %v1350_v26, %v3199_v48  ;;  %v1380_v41 = vcombine.high %v1364_v61, %v1364_v61  ;;  %v1381_v9 = vcombine.high %v1371_v6, %v1371_v6  ;;  %v3536_v27 = vrot.slane %v1371_v6, %v3061_v42  ;;  %2656 = vmatprep.subr.bf16.mxu1 %v3012_v24 }
 0xbe3   :  { %v3540_v17 = vrot.slane %v1379_v23, %v3061_v42  ;;  %v3543_v15 = vrot.slane %v1364_v61, %v3061_v42  ;;  %v3548_v10 = vsel %vm1838_vm7, %v3452_v38, %v3531_v0 }
 0xbe4   :  { %v1382_v22 = vcombine.high %v1378_v14, %v1378_v14  ;;  %v3551_v47 = vrot.slane %v1381_v9, %v3061_v42  ;;  %v3554_v21 = vrot.slane %v1378_v14, %v3061_v42  ;;  %v3557_v24 = vrot.slane %v1380_v41, %v3061_v42 }
 0xbe5   :  { %2658 = vmatpush1.bf16.msra.mxu1 %v3018_v29  ;;  %v3563_v60 = vsel %vm1838_vm7, %v3467_v59, %v3536_v27  ;;  %v3568_v38 = vsel %vm1838_vm7, %v3472_v16, %v3540_v17  ;;  %v3573_v46 = vsel %vm1838_vm7, %v3477_v3, %v3543_v15 }
 0xbe6   :  { %v3576_v57 = vrot.slane %v1382_v22, %v3061_v42  ;;  %2660 = vmatprep.subr.bf16.mxu1 %v3022_v31  ;;  %v1842_v29 = vsel %vm1838_vm7, %v3486_v11, %v3551_v47  ;;  %v1845_v59 = vsel %vm1838_vm7, %v3491_v37, %v3557_v24  ;;  %v1844_v16 = vsel %vm1838_vm7, %v3496_v1, %v3554_v21 }
 0xbe7   :  { %v4184_v11 = vsel %vm3087_vm1, %v3115_v18, %v3077_v55  ;;  %v4185_v37 = vsel %vm3093_vm2, %v3117_v20, %v3080_v58 }
 0xbe8   :  { %4183 = vst [vmem:[#allocation33_spill] sm:$0xff] %v3576_v57  ;;  %v3591_v3 = vsel %vm1838_vm7, %v3501_v44, %v3576_v57 }
 0xbe9   :  { %2662 = vmatpush1.bf16.msra.mxu1 %v3028_v34 }
 0xcaf   :  { %v883_v31 = vpop.f32.mrb[6].mxu1 }
 0xcb0   :  { %v884_v30 = vadd.f32 %v883_v31, %v4184_v11  ;;  %v885_v7 = vpop.f32.mrb[7].mxu1 }
 0xcb1   :  { %v886_v1 = vadd.f32 %v885_v7, %v4185_v37 }
 0xcb2   :  { %v2520_v44 = vmul.f32 -1.442695, %v884_v30 }
 0xcb3   :  { %2737 = vtanh.f32 %v886_v1  ;;  %v2521_v20 = vmul.f32 -1.442695, %v886_v1 }
 0xcb4   :  { %2739 = vpow2.f32 %v2520_v44 }
 0xcbd   :  { %v2738_v26 = vpop.eup %2737 }
 0xcbe   :  { %903 = vrot.lane.b32.xlu1 %v2738_v26, %s2907_s2  ;;  %v2740_v34 = vpop.eup %2739 }
 0xcbf   :  { %v894_v61 = vadd.f32 1.0, %v2740_v34 }
 0xcc1   :  { %2741 = vrcp.f32 %v894_v61 }
 0xccb   :  { %v2742_v6 = vpop.eup %2741 }
 0xccc   :  { %v901_v18 = vmul.f32 %v2742_v6, %v3517_v52 }
 0xd30   :  { %v904_v23 = vpop.permute.xlu1 %903 }
 0xd31   :  { %v906_v55 = vmul.f32 %v2742_v6, %v904_v23 }
 0xd33   :  { %908 = vrot.lane.b32.xlu0 %v906_v55, %s2907_s2 }
 0xda5   :  { %v909_v14 = vpop.permute.xlu0 %908 }
 0xda6   :  { %v911_v41 = vadd.f32 %v909_v14, %v901_v18 }
 0xda8   :  { %2743 = vtanh.f32 %v911_v41 }
 0xda9   :  { %2745 = vpow2.f32 %v2521_v20 }
 0xdb2   :  { %v2744_v58 = vpop.eup %2743 }
 0xdb3   :  { %914 = vrot.lane.b32.xlu1 %v2744_v58, %s2907_s2  ;;  %v2746_v9 = vpop.eup %2745 }
 0xdb4   :  { %v895_v22 = vadd.f32 1.0, %v2746_v9 }
 0xdb6   :  { %2747 = vrcp.f32 %v895_v22 }
 0xdc0   :  { %v2748_v31 = vpop.eup %2747 }
 0xe25   :  { %v915_v11 = vpop.permute.xlu1 %914 }
 0xe26   :  { %v917_v30 = vmul.f32 %v2748_v31, %v915_v11 }
 0xe28   :  { %v1383_v7 = vcombine.high %v917_v30, %v917_v30  ;;  %v1390_v37 = vrot.slane %v917_v30, %v3199_v48  ;;  %2522 = vmatmul.mubr.msk.f32.vlgmr.msra.gmra.mrb[20].mxu0 %vm283_vm3, %v917_v30 }
 0xe2a   :  { %v1397_v52 = vrot.slane %v1383_v7, %v3199_v48  ;;  %v1398_v26 = vcombine.high %v1390_v37, %v1390_v37  ;;  %v1406_v44 = vrot.slane %v1390_v37, %v3199_v48 }
 0xe2c   :  { %v1399_v34 = vcombine.high %v1397_v52, %v1397_v52  ;;  %v1413_v1 = vrot.slane %v1397_v52, %v3199_v48  ;;  %v1420_v61 = vrot.slane %v1398_v26, %v3199_v48  ;;  %v1428_v6 = vcombine.high %v1406_v44, %v1406_v44 }
 0xe2d   :  { %v3615_v23 = vrot.slane %v1406_v44, %v3061_v42 }
 0xe2e   :  { %v1427_v55 = vrot.slane %v1399_v34, %v3199_v48  ;;  %v1429_v18 = vcombine.high %v1413_v1, %v1413_v1  ;;  %v1430_v14 = vcombine.high %v1420_v61, %v1420_v61  ;;  %v3619_v58 = vrot.slane %v1420_v61, %v3061_v42 }
 0xe2f   :  { %v3622_v20 = vrot.slane %v1428_v6, %v3061_v42  ;;  %v3625_v9 = vrot.slane %v1413_v1, %v3061_v42  ;;  %v1848_v22 = vsel %vm1847_vm8, %v3548_v10, %v3615_v23 }
 0xe30   :  { %v1431_v31 = vcombine.high %v1427_v55, %v1427_v55  ;;  %v3631_v11 = vrot.slane %v1430_v14, %v3061_v42  ;;  %v3634_v30 = vrot.slane %v1427_v55, %v3061_v42  ;;  %v3637_v7 = vrot.slane %v1429_v18, %v3061_v42 }
 0xe31   :  { %v1849_v37 = vsel %vm1847_vm8, %v3563_v60, %v3619_v58  ;;  %v1850_v52 = vsel %vm1847_vm8, %v3568_v38, %v3622_v20  ;;  %v1852_v10 = vsel %vm1847_vm8, %v3573_v46, %v3625_v9  ;;  %v4187_v46 = vsel %vm3087_vm1, %v3135_v28, %v3071_v50 }
 0xe32   :  { %v1851_v26 = vsel %vm1847_vm8, %v1842_v29, %v3631_v11  ;;  %v1854_v44 = vsel %vm1847_vm8, %v1845_v59, %v3637_v7  ;;  %v3654_v34 = vsel %vm1847_vm8, %v1844_v16, %v3634_v30  ;;  %v3657_v60 = vrot.slane %v1431_v31, %v3061_v42 }
 0xe33   :  { %v4188_v59 = vsel %vm3093_vm2, %v3137_v32, %v3075_v53 }
 0xe34   :  { %4186 = vst [vmem:[#allocation34_spill] sm:$0xff] %v3657_v60  ;;  %v1855_v38 = vsel %vm1847_vm8, %v3591_v3, %v3657_v60 }
 0xefb   :  { %v989_v1 = vpop.f32.mrb[20].mxu0 }
 0xefc   :  { %v990_v29 = vadd.f32 %v989_v1, %v4187_v46  ;;  %v991_v61 = vpop.f32.mrb[21].mxu0 }
 0xefd   :  { %v992_v16 = vadd.f32 %v991_v61, %v4188_v59 }
 0xefe   :  { %v2523_v55 = vmul.f32 -1.442695, %v990_v29 }
 0xeff   :  { %2749 = vtanh.f32 %v992_v16  ;;  %v2524_v32 = vmul.f32 -1.442695, %v992_v16 }
 0xf00   :  { %2751 = vpow2.f32 %v2523_v55 }
 0xf09   :  { %v2750_v6 = vpop.eup %2749 }
 0xf0a   :  { %1009 = vrot.lane.b32.xlu0 %v2750_v6, %s2907_s2  ;;  %v2752_v3 = vpop.eup %2751 }
 0xf0b   :  { %v1000_v18 = vadd.f32 1.0, %v2752_v3 }
 0xf0d   :  { %2753 = vrcp.f32 %v1000_v18 }
 0xf17   :  { %v2754_v14 = vpop.eup %2753 }
 0xf18   :  { %v1007_v28 = vmul.f32 %v2754_v14, %v911_v41 }
 0xf7c   :  { %v1010_v31 = vpop.permute.xlu0 %1009 }
 0xf7d   :  { %v1012_v50 = vmul.f32 %v2754_v14, %v1010_v31 }
 0xf7f   :  { %1014 = vrot.lane.b32.xlu1 %v1012_v50, %s2907_s2 }
 0xff1   :  { %v1015_v1 = vpop.permute.xlu1 %1014 }
 0xff2   :  { %v1017_v46 = vadd.f32 %v1015_v1, %v1007_v28 }
 0xff4   :  { %2755 = vtanh.f32 %v1017_v46 }
 0xff5   :  { %2757 = vpow2.f32 %v2524_v32 }
 0xffe   :  { %v2756_v53 = vpop.eup %2755 }
 0xfff   :  { %1020 = vrot.lane.b32.xlu0 %v2756_v53, %s2907_s2  ;;  %v2758_v61 = vpop.eup %2757 }
0x1000   :  { %v1001_v29 = vadd.f32 1.0, %v2758_v61 }
0x1002   :  { %2759 = vrcp.f32 %v1001_v29 }
0x100c   :  { %v2760_v59 = vpop.eup %2759 }
0x1071   :  { %v1021_v6 = vpop.permute.xlu0 %1020 }
0x1072   :  { %v1023_v55 = vmul.f32 %v2760_v59, %v1021_v6 }
0x1074   :  { %v1432_v3 = vcombine.high %v1023_v55, %v1023_v55  ;;  %v1439_v18 = vrot.slane %v1023_v55, %v3199_v48  ;;  %2525 = vmatmul.mubr.msk.f32.vlgmr.msra.gmra.mrb[8].mxu1 %vm283_vm3, %v1023_v55 }
0x1076   :  { %v1446_v41 = vrot.slane %v1432_v3, %v3199_v48  ;;  %v1447_v14 = vcombine.high %v1439_v18, %v1439_v18  ;;  %v1455_v31 = vrot.slane %v1439_v18, %v3199_v48 }
0x1078   :  { %v1448_v50 = vcombine.high %v1446_v41, %v1446_v41  ;;  %v1462_v16 = vrot.slane %v1446_v41, %v3199_v48  ;;  %v1469_v28 = vrot.slane %v1447_v14, %v3199_v48  ;;  %v1477_v1 = vcombine.high %v1455_v31, %v1455_v31 }
0x1079   :  { %v3682_v53 = vrot.slane %v1455_v31, %v3061_v42 }
0x107a   :  { %v1476_v32 = vrot.slane %v1448_v50, %v3199_v48  ;;  %v1478_v61 = vcombine.high %v1462_v16, %v1462_v16  ;;  %v1479_v29 = vcombine.high %v1469_v28, %v1469_v28  ;;  %v3686_v59 = vrot.slane %v1469_v28, %v3061_v42 }
0x107b   :  { %v3689_v6 = vrot.slane %v1477_v1, %v3061_v42  ;;  %v3692_v55 = vrot.slane %v1462_v16, %v3061_v42  ;;  %v3696_v3 = vsel %vm1856_vm9, %v1848_v22, %v3682_v53 }
0x107c   :  { %v1480_v18 = vcombine.high %v1476_v32, %v1476_v32  ;;  %v3700_v41 = vsel %vm1856_vm9, %v1849_v37, %v3686_v59  ;;  %v3703_v14 = vrot.slane %v1479_v29, %v3061_v42  ;;  %v3706_v31 = vrot.slane %v1478_v61, %v3061_v42 }
0x107d   :  { %v3710_v50 = vsel %vm1856_vm9, %v1850_v52, %v3689_v6  ;;  %v3714_v16 = vsel %vm1856_vm9, %v1852_v10, %v3692_v55  ;;  %v3717_v22 = vrot.slane %v1476_v32, %v3061_v42  ;;  %v4191_v29 = vsel %vm3093_vm2, %v3161_v51, %v3159_v49 }
0x107e   :  { %v3721_v37 = vsel %vm1856_vm9, %v1851_v26, %v3703_v14  ;;  %v3725_v28 = vsel %vm1856_vm9, %v1854_v44, %v3706_v31  ;;  %v3728_v1 = vrot.slane %v1480_v18, %v3061_v42  ;;  %v4190_v26 = vsel %vm3087_vm1, %v3157_v40, %v3155_v39 }
0x107f   :  { %v3733_v52 = vsel %vm1856_vm9, %v3654_v34, %v3717_v22  ;;  %vm2076_vm1 = vcmask 1046534   ;;  %vm2078_vm2 = vcmask 1047559  }
0x1080   :  { %v3737_v10 = vsel %vm1856_vm9, %v1855_v38, %v3728_v1 }
0x1081   :  { %4189 = vst [vmem:[#allocation35_spill] sm:$0xff] %v3737_v10 }
0x1147   :  { %v1095_v32 = vpop.f32.mrb[8].mxu1 }
0x1148   :  { %v1096_v44 = vadd.f32 %v1095_v32, %v4190_v26  ;;  %v1097_v61 = vpop.f32.mrb[9].mxu1 }
0x1149   :  { %v1098_v18 = vadd.f32 %v1097_v61, %v4191_v29 }
0x114a   :  { %v2526_v38 = vmul.f32 -1.442695, %v1096_v44 }
0x114b   :  { %2761 = vtanh.f32 %v1098_v18  ;;  %v2527_v51 = vmul.f32 -1.442695, %v1098_v18  ;;  %v1889_v18 = vrot.slane %v3209_v33, %v3061_v42 }
0x114c   :  { %2763 = vpow2.f32 %v2526_v38 }
0x1155   :  { %v2762_v34 = vpop.eup %2761 }
0x1156   :  { %1115 = vrot.lane.b32.xlu1 %v2762_v34, %s2907_s2  ;;  %v2764_v57 = vpop.eup %2763 }
0x1157   :  { %v1106_v60 = vadd.f32 1.0, %v2764_v57 }
0x1159   :  { %2765 = vrcp.f32 %v1106_v60 }
0x1163   :  { %v2766_v4 = vpop.eup %2765 }
0x1164   :  { %v1113_v40 = vmul.f32 %v2766_v4, %v1017_v46  ;;  %v1885_v46 = vrot.slane %v3206_v25, %v3061_v42  ;;  %v1909_v25 = vrot.slane %v3254_v36, %v3061_v42 }
0x11c8   :  { %v1116_v10 = vpop.permute.xlu1 %1115 }
0x11c9   :  { %v1118_v39 = vmul.f32 %v2766_v4, %v1116_v10 }
0x11cb   :  { %1120 = vrot.lane.b32.xlu0 %v1118_v39, %s2907_s2  ;;  %v1893_v39 = vrot.slane %v3226_v62, %v3061_v42 }
0x123d   :  { %v1121_v8 = vpop.permute.xlu0 %1120 }
0x123e   :  { %v1123_v32 = vadd.f32 %v1121_v8, %v1113_v40  ;;  %v1901_v40 = vrot.slane %v3217_v43, %v3061_v42  ;;  %v1897_v8 = vrot.slane %v3234_v63, %v3061_v42  ;;  %v4201_v63 = vld [vmem:[#allocation16_spill] sm:$0xff] }
0x1240   :  { %2767 = vtanh.f32 %v1123_v32 }
0x1241   :  { %2769 = vpow2.f32 %v2527_v51 }
0x124a   :  { %v2768_v49 = vpop.eup %2767 }
0x124b   :  { %1126 = vrot.lane.b32.xlu1 %v2768_v49, %s2907_s2  ;;  %v2770_v26 = vpop.eup %2769 }
0x124c   :  { %v1107_v44 = vadd.f32 1.0, %v2770_v26 }
0x124e   :  { %2771 = vrcp.f32 %v1107_v44 }
0x1258   :  { %v2772_v61 = vpop.eup %2771 }
0x12bd   :  { %v1127_v57 = vpop.permute.xlu1 %1126 }
0x12be   :  { %v1129_v60 = vmul.f32 %v2772_v61, %v1127_v57 }
0x12c0   :  { %v1482_v29 = vcombine.high %v1129_v60, %v1129_v60  ;;  %v1489_v10 = vrot.slane %v1129_v60, %v3199_v48 }
0x12c2   :  { %v1496_v34 = vrot.slane %v1482_v29, %v3199_v48  ;;  %v1497_v38 = vcombine.high %v1489_v10, %v1489_v10  ;;  %v1505_v4 = vrot.slane %v1489_v10, %v3199_v48 }
0x12c4   :  { %v1498_v32 = vcombine.high %v1496_v34, %v1496_v34  ;;  %v1512_v49 = vrot.slane %v1496_v34, %v3199_v48  ;;  %v1519_v51 = vrot.slane %v1497_v38, %v3199_v48  ;;  %v1527_v26 = vcombine.high %v1505_v4, %v1505_v4 }
0x12c5   :  { %v1774_v33 = vrot.slane %v1505_v4, %v3061_v42  ;;  %v1922_v62 = vsel %vm1811_vm4, %v1505_v4, %v3682_v53 }
0x12c6   :  { %v3773_v43 = vrot.slane %v1498_v32, %v3199_v48  ;;  %v1528_v44 = vcombine.high %v1512_v49, %v1512_v49  ;;  %v1529_v61 = vcombine.high %v1519_v51, %v1519_v51  ;;  %v1923_v57 = vsel %vm1811_vm4, %v1519_v51, %v3686_v59 }
0x12c7   :  { %v1924_v60 = vsel %vm1811_vm4, %v1527_v26, %v3689_v6  ;;  %v1926_v29 = vsel %vm1811_vm4, %v1512_v49, %v3692_v55  ;;  %v1930_v10 = vsel %vm1820_vm5, %v1922_v62, %v3615_v23  ;;  %v1931_v53 = vsel %vm1820_vm5, %v1923_v57, %v3619_v58 }
0x12c8   :  { %v1932_v48 = vsel %vm1820_vm5, %v1924_v60, %v3622_v20  ;;  %v1934_v34 = vsel %vm1820_vm5, %v1926_v29, %v3625_v9  ;;  %v1938_v59 = vsel %vm1829_vm6, %v1930_v10, %v3531_v0  ;;  %v1866_v6 = vsel %vm1865_vm10, %v3696_v3, %v1774_v33  ;;  %v4193_v33 = vld [vmem:[#allocation23_spill] sm:$0xff]  ;;  %v4194_v29 = vld [vmem:[#allocation17_spill] sm:$0xff] }
0x12c9   :  { %v1946_v55 = vsel %vm1838_vm7, %v1938_v59, %v3435_v56  ;;  %v1778_v23 = vrot.slane %v1519_v51, %v3061_v42  ;;  %v1939_v58 = vsel %vm1829_vm6, %v1931_v53, %v3536_v27  ;;  %v1782_v38 = vrot.slane %v1527_v26, %v3061_v42  ;;  %v3811_v27 = vld [vmem:[%s4123_s4] ss:$0 sm:$0xff] }
0x12ca   :  { %v1954_v20 = vsel %vm1847_vm8, %v1946_v55, %v3338_v45  ;;  %v1947_v9 = vsel %vm1838_vm7, %v1939_v58, %v3440_v19  ;;  %v1940_v0 = vsel %vm1829_vm6, %v1932_v48, %v3540_v17  ;;  %v1790_v3 = vrot.slane %v1512_v49, %v3061_v42  ;;  %v4195_v58 = vld [vmem:[#allocation29_spill] sm:$0xff] }
0x12cb   :  { %v1962_v56 = vsel %vm1856_vm9, %v1954_v20, %v3229_v2  ;;  %v1867_v4 = vsel %vm1865_vm10, %v3700_v41, %v1778_v23  ;;  %v1955_v45 = vsel %vm1847_vm8, %v1947_v9, %v3343_v54  ;;  %v1868_v19 = vsel %vm1865_vm10, %v3710_v50, %v1782_v38  ;;  %v4196_v9 = vld [vmem:[#allocation24_spill] sm:$0xff] }
0x12cc   :  { %v1970_v17 = vsel %vm1865_vm10, %v1962_v56, %v1885_v46  ;;  %v1963_v32 = vsel %vm1856_vm9, %v1955_v45, %v3238_v12  ;;  %v1948_v2 = vsel %vm1838_vm7, %v1940_v0, %v3444_v13  ;;  %v1870_v49 = vsel %vm1865_vm10, %v3714_v16, %v1790_v3  ;;  %v4192_v16 = vld [vmem:[#allocation28_spill] sm:$0xff]  ;;  %v4197_v0 = vld [vmem:[#allocation31_spill] sm:$0xff]  ;;  %v4199_v56 = vld [vmem:[#allocation26_spill] sm:$0xff] }
0x12cd   :  { %v3827_v51 = vsel %vm1978_vm11, %v1866_v6, %v1970_v17  ;;  %v1971_v41 = vsel %vm1865_vm10, %v1963_v32, %v1889_v18  ;;  %v1956_v54 = vsel %vm1847_vm8, %v1948_v2, %v3347_v35  ;;  %v1942_v50 = vsel %vm1829_vm6, %v1934_v34, %v3543_v15  ;;  %v4200_v32 = vld [vmem:[#allocation19_spill] sm:$0xff] }
0x12ce   :  { %v1994_v12 = vmul.f32 %v3811_v27, %v3827_v51  ;;  %v3837_v46 = vsel %vm1978_vm11, %v1867_v4, %v1971_v41  ;;  %v1964_v13 = vsel %vm1856_vm9, %v1956_v54, %v3242_v5  ;;  %v1950_v26 = vsel %vm1838_vm7, %v1942_v50, %v4192_v16 }
0x12cf   :  { %v1995_v18 = vmul.f32 %v3811_v27, %v3837_v46  ;;  %v1972_v35 = vsel %vm1865_vm10, %v1964_v13, %v1893_v39  ;;  %v1958_v15 = vsel %vm1847_vm8, %v1950_v26, %v4193_v33  ;;  %v1786_v62 = vrot.slane %v1529_v61, %v3061_v42  ;;  %v4205_v33 = vld [vmem:[#allocation35_spill] sm:$0xff] }
0x12d0   :  { %v2002_v57 = vsel %vm283_vm3, %v1994_v12, 0.0  ;;  %v3851_v60 = vsel %vm1978_vm11, %v1868_v19, %v1972_v35  ;;  %v1966_v5 = vsel %vm1856_vm9, %v1958_v15, %v4194_v29  ;;  %v1925_v10 = vsel %vm1811_vm4, %v1529_v61, %v3703_v14 }
0x12d1   :  { %2003 = vadd.xlane.f32.xlu0 %v2002_v57  ;;  %v2005_v53 = vsel %vm283_vm3, %v1995_v18, 0.0  ;;  %v1996_v39 = vmul.f32 %v3811_v27, %v3851_v60  ;;  %v1974_v48 = vsel %vm1865_vm10, %v1966_v5, %v1901_v40  ;;  %v1869_v34 = vsel %vm1865_vm10, %v3721_v37, %v1786_v62  ;;  %v4206_v62 = vld [vmem:[#allocation34_spill] sm:$0xff] }
0x12d2   :  { %2006 = vadd.xlane.f32.xlu1 %v2005_v53  ;;  %v3864_v59 = vsel %vm1978_vm11, %v1870_v49, %v1974_v48  ;;  %v1933_v6 = vsel %vm1820_vm5, %v1925_v10, %v3631_v11  ;;  %v1798_v14 = vrot.slane %v1528_v44, %v3061_v42  ;;  %v1928_v61 = vsel %vm1811_vm4, %v1528_v44, %v3706_v31  ;;  %v4207_v10 = vld [vmem:[#allocation33_spill] sm:$0xff] }
0x12d3   :  { %v2008_v55 = vsel %vm283_vm3, %v1996_v39, 0.0  ;;  %v1998_v40 = vmul.f32 %v3811_v27, %v3864_v59  ;;  %v1941_v37 = vsel %vm1829_vm6, %v1933_v6, %v3551_v47  ;;  %v1936_v23 = vsel %vm1820_vm5, %v1928_v61, %v3637_v7  ;;  %v4208_v39 = vld [vmem:[#allocation32_spill] sm:$0xff] }
0x12d4   :  { %v1949_v38 = vsel %vm1838_vm7, %v1941_v37, %v4195_v58  ;;  %v1872_v11 = vsel %vm1865_vm10, %v3725_v28, %v1798_v14  ;;  %v1944_v31 = vsel %vm1829_vm6, %v1936_v23, %v3557_v24  ;;  %v1794_v44 = vrot.slane %v3773_v43, %v3061_v42  ;;  %v4198_v28 = vld [vmem:[#allocation18_spill] sm:$0xff]  ;;  %v4210_v14 = vld [vmem:[#allocation27_spill] sm:$0xff] }
0x12d5   :  { %2009 = vadd.xlane.f32.xlu0 %v2008_v55  ;;  %v2014_v20 = vsel %vm283_vm3, %v1998_v40, 0.0  ;;  %v1957_v47 = vsel %vm1847_vm8, %v1949_v38, %v4196_v9  ;;  %v1952_v7 = vsel %vm1838_vm7, %v1944_v31, %v4197_v0  ;;  %v1927_v3 = vsel %vm1811_vm4, %v3773_v43, %v3717_v22  ;;  %v4211_v40 = vld [vmem:[#allocation22_spill] sm:$0xff]  ;;  %v4213_v9 = vld [vmem:[#allocation15_spill] sm:$0xff] }
0x12d6   :  { %2015 = vadd.xlane.f32.xlu1 %v2014_v20  ;;  %v1965_v24 = vsel %vm1856_vm9, %v1957_v47, %v4198_v28  ;;  %v1960_v4 = vsel %vm1847_vm8, %v1952_v7, %v4199_v56  ;;  %v1871_v45 = vsel %vm1865_vm10, %v3733_v52, %v1794_v44  ;;  %v1935_v19 = vsel %vm1820_vm5, %v1927_v3, %v3634_v30  ;;  %v4212_v20 = vld [vmem:[#allocation13_spill] sm:$0xff] }
0x12d7   :  { %v1973_v17 = vsel %vm1865_vm10, %v1965_v24, %v1897_v8  ;;  %v1968_v22 = vsel %vm1856_vm9, %v1960_v4, %v4200_v32  ;;  %v1943_v2 = vsel %vm1829_vm6, %v1935_v19, %v3554_v21  ;;  %v1530_v49 = vcombine.high %v3773_v43, %v3773_v43  ;;  %v4202_v8 = vld [vmem:[#allocation30_spill] sm:$0xff]  ;;  %v4203_v43 = vld [vmem:[#allocation25_spill] sm:$0xff] }
0x12d8   :  { %v3913_v41 = vsel %vm1978_vm11, %v1869_v34, %v1973_v17  ;;  %v1976_v30 = vsel %vm1865_vm10, %v1968_v22, %v1909_v25  ;;  %v1905_v52 = vrot.slane %v4201_v63, %v3061_v42  ;;  %v1951_v54 = vsel %vm1838_vm7, %v1943_v2, %v4202_v8  ;;  %v4204_v25 = vld [vmem:[#allocation20_spill] sm:$0xff]  ;;  %v4209_v34 = vld [vmem:[#allocation21_spill] sm:$0xff] }
0x12d9   :  { %v1997_v21 = vmul.f32 %v3811_v27, %v3913_v41  ;;  %v3926_v50 = vsel %vm1978_vm11, %v1872_v11, %v1976_v30  ;;  %v1959_v12 = vsel %vm1847_vm8, %v1951_v54, %v4203_v43  ;;  %v1802_v13 = vrot.slane %v1530_v49, %v3061_v42 }
0x12da   :  { %v2000_v36 = vmul.f32 %v3811_v27, %v3926_v50  ;;  %v1967_v16 = vsel %vm1856_vm9, %v1959_v12, %v4204_v25  ;;  %v1929_v26 = vsel %vm1811_vm4, %v1530_v49, %v3728_v1  ;;  %v1913_v6 = vrot.slane %v4209_v34, %v3061_v42 }
0x12db   :  { %v2011_v18 = vsel %vm283_vm3, %v1997_v21, 0.0  ;;  %v1975_v35 = vsel %vm1865_vm10, %v1967_v16, %v1905_v52  ;;  %v1873_v15 = vsel %vm1865_vm10, %v4205_v33, %v1802_v13  ;;  %v1937_v57 = vsel %vm1820_vm5, %v1929_v26, %v4206_v62  ;;  %v4214_v26 = vld [vmem:[#allocation14_spill] sm:$0xff] }
0x12dc   :  { %2012 = vadd.xlane.f32.xlu0 %v2011_v18  ;;  %v2020_v29 = vsel %vm283_vm3, %v2000_v36, 0.0  ;;  %v3945_v5 = vsel %vm1978_vm11, %v1871_v45, %v1975_v35  ;;  %v1945_v53 = vsel %vm1829_vm6, %v1937_v57, %v4207_v10  ;;  %v3969_v47 = vsub.s32 %v4213_v9, %v4212_v20 }
0x12dd   :  { %2021 = vadd.xlane.f32.xlu1 %v2020_v29  ;;  %v1999_v1 = vmul.f32 %v3811_v27, %v3945_v5  ;;  %v1953_v48 = vsel %vm1838_vm7, %v1945_v53, %v4208_v39  ;;  %vm2081_vm4 = vcmask 64512   ;;  %v2909_v12 = vmov 0  }
0x12de   :  { %v1961_v61 = vsel %vm1847_vm8, %v1953_v48, %v4210_v14  ;;  %2676 = vset.pattern.permute.xlu1 %v2909_v12  ;;  %2675 = vset.pattern.permute.xlu0 %v2909_v12  ;;  %v2096_v13 = vsub.s32 2, %v4212_v20  ;;  %v2100_v36 = vsub.s32 3, %v4212_v20  ;;  %v2104_v62 = vsub.s32 4, %v4212_v20 }
0x12df   :  { %v2017_v55 = vsel %vm283_vm3, %v1999_v1, 0.0  ;;  %v1969_v37 = vsel %vm1856_vm9, %v1961_v61, %v4211_v40  ;;  %v2108_v1 = vsub.s32 5, %v4212_v20  ;;  %v2116_v40 = vsub.s32 7, %v4212_v20 }
0x12e0   :  { %2018 = vadd.xlane.f32.xlu0 %v2017_v55  ;;  %v1977_v23 = vsel %vm1865_vm10, %v1969_v37, %v1913_v6  ;;  %v2112_v6 = vsub.s32 6, %v4212_v20  ;;  %vm2476_vm5 = vcmask 7168   ;;  %vm2478_vm6 = vcmask 72704  }
0x12e1   :  { %v3962_v58 = vsel %vm1978_vm11, %v1873_v15, %v1977_v23 }
0x12e2   :  { %v2001_v38 = vmul.f32 %v3811_v27, %v3962_v58 }
0x12e4   :  { %v2023_v11 = vsel %vm283_vm3, %v2001_v38, 0.0 }
0x12e5   :  { %2024 = vadd.xlane.f32.xlu0 %v2023_v11 }
0x135e   :  { %v2004_v31 = vpop.xlane.xlu0 %2003 }
0x135f   :  { %v2007_v44 = vpop.xlane.xlu1 %2006  ;;  %v2037_v3 = vrot.slane %v2004_v31, %v3969_v47 }
0x1360   :  { %v2041_v7 = vrot.slane %v2007_v44, %v3969_v47 }
0x1362   :  { %v2010_v0 = vpop.xlane.xlu0 %2009  ;;  %v2067_v24 = vsel %vm2066_vm12, %v2041_v7, %v2037_v3 }
0x1363   :  { %v2045_v28 = vrot.slane %v2010_v0, %v3969_v47  ;;  %v2016_v27 = vpop.xlane.xlu1 %2015 }
0x1364   :  { %v2053_v32 = vrot.slane %v2016_v27, %v3969_v47 }
0x1365   :  { %v2069_v45 = vsel %vm2068_vm13, %v2045_v28, %v2067_v24 }
0x1369   :  { %v2013_v56 = vpop.xlane.xlu0 %2012 }
0x136a   :  { %v2049_v4 = vrot.slane %v2013_v56, %v3969_v47  ;;  %v2022_v2 = vpop.xlane.xlu1 %2021 }
0x136b   :  { %v2061_v63 = vrot.slane %v2022_v2, %v3969_v47 }
0x136c   :  { %v2071_v19 = vsel %vm2070_vm14, %v2049_v4, %v2069_v45 }
0x136d   :  { %v2019_v17 = vpop.xlane.xlu0 %2018  ;;  %v2073_v49 = vsel %vm2072_vm15, %v2053_v32, %v2071_v19 }
0x136e   :  { %v2057_v22 = vrot.slane %v2019_v17, %v3969_v47 }
0x1370   :  { %v2075_v30 = vsel %vm2074_vm0, %v2057_v22, %v2073_v49 }
0x1371   :  { %v2077_v54 = vsel %vm2076_vm1, %v2061_v63, %v2075_v30 }
0x1372   :  { %v2025_v52 = vpop.xlane.xlu0 %2024 }
0x1373   :  { %v2065_v8 = vrot.slane %v2025_v52, %v3969_v47 }
0x1375   :  { %v2079_v21 = vsel %vm2078_vm2, %v2065_v8, %v2077_v54 }
0x1376   :  { %v2082_v43 = vsel %vm2081_vm4, %v2079_v21, -inf }
0x1377   :  { %2083 = vmax.xlane.f32.xlu1 %v2082_v43 }
0x1404   :  { %v2084_v25 = vpop.xlane.xlu1 %2083 }
0x1405   :  { %v2089_v16 = vrot.slane %v2084_v25, %v3061_v42  ;;  %v2093_v18 = vrot.slane %v2084_v25, %v4214_v26  ;;  %v2097_v35 = vrot.slane %v2084_v25, %v2096_v13  ;;  %v2101_v57 = vrot.slane %v2084_v25, %v2100_v36 }
0x1406   :  { %v2105_v39 = vrot.slane %v2084_v25, %v2104_v62  ;;  %v2109_v14 = vrot.slane %v2084_v25, %v2108_v1  ;;  %v2113_v37 = vrot.slane %v2084_v25, %v2112_v6 }
0x1407   :  { %v2126_v33 = vsub.f32 %v2004_v31, %v2089_v16  ;;  %v2127_v15 = vsub.f32 %v2007_v44, %v2093_v18  ;;  %v2128_v29 = vsub.f32 %v2010_v0, %v2097_v35  ;;  %v2129_v48 = vsub.f32 %v2013_v56, %v2101_v57 }
0x1408   :  { %v2130_v61 = vsub.f32 %v2016_v27, %v2105_v39  ;;  %v2131_v23 = vsub.f32 %v2019_v17, %v2109_v14  ;;  %v2117_v44 = vrot.slane %v2084_v25, %v2116_v40  ;;  %v2132_v0 = vsub.f32 %v2022_v2, %v2113_v37 }
0x1409   :  { %v2134_v10 = vmul.f32 1.442695, %v2126_v33  ;;  %v2136_v53 = vmul.f32 1.442695, %v2127_v15  ;;  %v2138_v34 = vmul.f32 1.442695, %v2128_v29 }
0x140a   :  { %v2140_v55 = vmul.f32 1.442695, %v2129_v48  ;;  %v2142_v38 = vmul.f32 1.442695, %v2130_v61  ;;  %v2144_v7 = vmul.f32 1.442695, %v2131_v23  ;;  %v2133_v28 = vsub.f32 %v2025_v52, %v2117_v44 }
0x140b   :  { %2773 = vpow2.f32 %v2134_v10  ;;  %v2146_v24 = vmul.f32 1.442695, %v2132_v0 }
0x140c   :  { %2775 = vpow2.f32 %v2136_v53  ;;  %v2148_v56 = vmul.f32 1.442695, %v2133_v28 }
0x140d   :  { %2777 = vpow2.f32 %v2138_v34 }
0x140e   :  { %2779 = vpow2.f32 %v2140_v55 }
0x140f   :  { %2781 = vpow2.f32 %v2142_v38 }
0x1410   :  { %2783 = vpow2.f32 %v2144_v7 }
0x1411   :  { %2785 = vpow2.f32 %v2146_v24 }
0x1412   :  { %2787 = vpow2.f32 %v2148_v56 }
0x1415   :  { %v4005_v11 = vpop.eup %2773 }
0x1416   :  { %v2776_v31 = vpop.eup %2775  ;;  %2159 = vperm.xlu0 %2675, %v4005_v11  }
0x1417   :  { %2162 = vperm.xlu1 %2676, %v2776_v31   ;;  %v2778_v3 = vpop.eup %2777 }
0x1418   :  { %v4010_v27 = vpop.eup %2779 }
0x1419   :  { %v4013_v4 = vpop.eup %2781 }
0x141a   :  { %v4016_v45 = vpop.eup %2783 }
0x141b   :  { %2165 = vperm.xlu1 %2676, %v2778_v3   ;;  %v4019_v19 = vpop.eup %2785 }
0x141c   :  { %v4022_v17 = vpop.eup %2787 }
0x141f   :  { %2168 = vperm.xlu1 %2676, %v4010_v27  }
0x1423   :  { %2171 = vperm.xlu1 %2676, %v4013_v4  }
0x1427   :  { %2174 = vperm.xlu1 %2676, %v4016_v45  }
0x142b   :  { %2177 = vperm.xlu1 %2676, %v4019_v19  }
0x142f   :  { %2180 = vperm.xlu1 %2676, %v4022_v17  }
0x1495   :  { %v2160_v30 = vpop.permute.xlu0 %2159 }
0x1496   :  { %v2163_v32 = vpop.permute.xlu1 %2162  ;;  %v2185_v8 = vrot.slane %v2160_v30, %v3969_v47 }
0x1497   :  { %v2189_v52 = vrot.slane %v2163_v32, %v3969_v47 }
0x1499   :  { %v2214_v25 = vsel %vm2066_vm12, %v2189_v52, %v2185_v8 }
0x149a   :  { %v2166_v22 = vpop.permute.xlu1 %2165 }
0x149b   :  { %v2193_v54 = vrot.slane %v2166_v22, %v3969_v47 }
0x149d   :  { %v2215_v18 = vsel %vm2068_vm13, %v2193_v54, %v2214_v25 }
0x149e   :  { %v2169_v2 = vpop.permute.xlu1 %2168 }
0x149f   :  { %v2197_v21 = vrot.slane %v2169_v2, %v3969_v47 }
0x14a1   :  { %v2216_v33 = vsel %vm2070_vm14, %v2197_v21, %v2215_v18 }
0x14a2   :  { %v2172_v49 = vpop.permute.xlu1 %2171 }
0x14a3   :  { %v2201_v43 = vrot.slane %v2172_v49, %v3969_v47 }
0x14a5   :  { %v2217_v15 = vsel %vm2072_vm15, %v2201_v43, %v2216_v33 }
0x14a6   :  { %v2175_v63 = vpop.permute.xlu1 %2174 }
0x14a7   :  { %v2205_v16 = vrot.slane %v2175_v63, %v3969_v47 }
0x14a9   :  { %v2218_v29 = vsel %vm2074_vm0, %v2205_v16, %v2217_v15 }
0x14aa   :  { %v2178_v12 = vpop.permute.xlu1 %2177 }
0x14ab   :  { %v2209_v35 = vrot.slane %v2178_v12, %v3969_v47 }
0x14ad   :  { %v2219_v53 = vsel %vm2076_vm1, %v2209_v35, %v2218_v29 }
0x14ae   :  { %v2181_v57 = vpop.permute.xlu1 %2180 }
0x14af   :  { %v2213_v10 = vrot.slane %v2181_v57, %v3969_v47 }
0x14b1   :  { %v2220_v39 = vsel %vm2078_vm2, %v2213_v10, %v2219_v53 }
0x14b2   :  { %v2222_v48 = vsel %vm2081_vm4, %v2220_v39, 0.0 }
0x14b3   :  { %2223 = vadd.xlane.f32.xlu1 %v2222_v48 }
0x1540   :  { %v2224_v34 = vpop.xlane.xlu1 %2223 }
0x1541   :  { %v2233_v14 = vrot.slane %v2224_v34, %v4214_v26  ;;  %v2237_v61 = vrot.slane %v2224_v34, %v2096_v13  ;;  %v2229_v55 = vrot.slane %v2224_v34, %v3061_v42  ;;  %v2241_v47 = vrot.slane %v2224_v34, %v2100_v36 }
0x1542   :  { %v2245_v23 = vrot.slane %v2224_v34, %v2104_v62  ;;  %v2249_v13 = vrot.slane %v2224_v34, %v2108_v1  ;;  %v2253_v42 = vrot.slane %v2224_v34, %v2112_v6  ;;  %v2257_v62 = vrot.slane %v2224_v34, %v2116_v40 }
0x1543   :  { %2789 = vrcp.f32 %v2233_v14  ;;  %v2435_v40 = vadd.s32 4294967295, %v4213_v9 }
0x1544   :  { %2791 = vrcp.f32 %v2237_v61 }
0x1545   :  { %2793 = vrcp.f32 %v2229_v55 }
0x1546   :  { %2795 = vrcp.f32 %v2241_v47 }
0x1547   :  { %2797 = vrcp.f32 %v2245_v23 }
0x1548   :  { %2799 = vrcp.f32 %v2249_v13 }
0x1549   :  { %2801 = vrcp.f32 %v2253_v42 }
0x154a   :  { %2803 = vrcp.f32 %v2257_v62 }
0x154d   :  { %v2790_v37 = vpop.eup %2789 }
0x154e   :  { %v2269_v38 = vmul.f32 %v2790_v37, %v2776_v31  ;;  %v2792_v44 = vpop.eup %2791 }
0x154f   :  { %v2271_v26 = vmul.f32 %v2792_v44, %v2778_v3  ;;  %v2794_v0 = vpop.eup %2793 }
0x1550   :  { %2289 = vperm.xlu0 %2675, %v2269_v38   ;;  %v2267_v36 = vmul.f32 %v2794_v0, %v4005_v11  ;;  %v2796_v7 = vpop.eup %2795 }
0x1551   :  { %v2273_v31 = vmul.f32 %v2796_v7, %v4010_v27  ;;  %v2798_v28 = vpop.eup %2797  ;;  %v4063_v27 = vsub.s32 %v2435_v40, %v4212_v20 }
0x1552   :  { %v2275_v1 = vmul.f32 %v2798_v28, %v4013_v4  ;;  %v2800_v3 = vpop.eup %2799 }
0x1553   :  { %v2277_v24 = vmul.f32 %v2800_v3, %v4016_v45  ;;  %v2802_v6 = vpop.eup %2801 }
0x1554   :  { %2294 = vperm.xlu0 %2675, %v2271_v26   ;;  %v2279_v11 = vmul.f32 %v2802_v6, %v4019_v19  ;;  %v2804_v56 = vpop.eup %2803 }
0x1555   :  { %v2281_v32 = vmul.f32 %v2804_v56, %v4022_v17 }
0x1558   :  { %2284 = vperm.xlu0 %2675, %v2267_v36  }
0x155c   :  { %2299 = vperm.xlu0 %2675, %v2273_v31  }
0x1560   :  { %2304 = vperm.xlu0 %2675, %v2275_v1  }
0x1564   :  { %2309 = vperm.xlu0 %2675, %v2277_v24  }
0x1568   :  { %2314 = vperm.xlu0 %2675, %v2279_v11  }
0x156c   :  { %2319 = vperm.xlu0 %2675, %v2281_v32  }
0x15cf   :  { %v2290_v22 = vpop.permute.xlu0 %2289 }
0x15d0   :  { %v2443_v4 = vrot.slane %v2290_v22, %v4063_v27  ;;  %v2323_v2 = vmul.f32 %v2290_v22, %v3837_v46 }
0x15d2   :  { %v2337_v30 = vsel %vm283_vm3, %v2323_v2, 0.0 }
0x15d3   :  { %v2295_v45 = vpop.permute.xlu0 %2294  ;;  %v2338_v52 = vrot.slane %v2337_v30, 4 }
0x15d4   :  { %v2447_v49 = vrot.slane %v2295_v45, %v4063_v27  ;;  %v2324_v19 = vmul.f32 %v2295_v45, %v3851_v60 }
0x15d5   :  { %v2339_v16 = vadd.f32 %v2338_v52, %v2337_v30 }
0x15d6   :  { %v2344_v20 = vsel %vm283_vm3, %v2324_v19, 0.0 }
0x15d7   :  { %v2285_v63 = vpop.permute.xlu0 %2284  ;;  %v2345_v12 = vrot.slane %v2344_v20, 4  ;;  %v2340_v53 = vrot.slane %v2339_v16, 2 }
0x15d8   :  { %v2322_v17 = vmul.f32 %v2285_v63, %v3827_v51  ;;  %v2439_v9 = vrot.slane %v2285_v63, %v4063_v27  ;;  %v2529_v63 = vld [vmem:[%s4124_s5] ss:$0 sm:$0xff]  ;;  %s2910_s5 = smov [#allocation9]  }
0x15d9   :  { %v2346_v57 = vadd.f32 %v2345_v12, %v2344_v20  ;;  %v2341_v38 = vadd.f32 %v2340_v53, %v2339_v16  ;;  %s2487_s20 = sshll.u32 %s2910_s5, 4  ;;  %s2488_s20 = int_to_ptr.vmem [resolvable:$true] %s2487_s20 }
0x15da   :  { %v2330_v8 = vsel %vm283_vm3, %v2322_v17, 0.0  ;;  %v2468_v54 = vsel %vm2066_vm12, %v2443_v4, %v2439_v9  ;;  %s2871_s21 = scalar_lea.vmem %s2488_s20, 128  ;;  %p2876_p11 = scmp.lt.s32.totalorder %s2488_s20, %s2488_s20 }
0x15db   :  { %v2331_v46 = vrot.slane %v2330_v8, 4  ;;  %v2469_v21 = vsel %vm2068_vm13, %v2447_v49, %v2468_v54  ;;  %v2300_v43 = vpop.permute.xlu0 %2299  ;;  %v2347_v47 = vrot.slane %v2346_v57, 2  ;;  %v2342_v1 = vrot.slane %v2341_v38, 1  ;;  %p2872_p10 = scmp.ne.s32.totalorder %s2488_s20, %s2871_s21  ;;  %p2877_p12 = scmp.lt.s32.totalorder %s2871_s21, %s2871_s21 }
0x15dc   :  { %v2325_v60 = vmul.f32 %v2300_v43, %v3913_v41  ;;  %v2451_v25 = vrot.slane %v2300_v43, %v4063_v27 }
0x15dd   :  { %v2332_v51 = vadd.f32 %v2331_v46, %v2330_v8  ;;  %v2348_v62 = vadd.f32 %v2347_v47, %v2346_v57  ;;  %v2343_v49 = vadd.f32 %v2342_v1, %v2341_v38  ;;  %p2878_p13 = por %p2877_p12, %p2876_p11 }
0x15de   :  { %v2351_v18 = vsel %vm283_vm3, %v2325_v60, 0.0  ;;  %v2470_v35 = vsel %vm2070_vm14, %v2451_v25, %v2469_v21 }
0x15df   :  { %v2352_v33 = vrot.slane %v2351_v18, 4  ;;  %v2305_v15 = vpop.permute.xlu0 %2304  ;;  %v2333_v48 = vrot.slane %v2332_v51, 2  ;;  %v2349_v4 = vrot.slane %v2348_v62, 1  ;;  %v2394_v43 = vmul.f32 %v2529_v63, %v2343_v49  ;;  %p2879_p0 = pnand %p2878_p13, %p2872_p10 }
0x15e0   :  { %v2326_v29 = vmul.f32 %v2305_v15, %v3864_v59  ;;  %v2455_v10 = vrot.slane %v2305_v15, %v4063_v27 }
0x15e1   :  { %v2353_v39 = vadd.f32 %v2352_v33, %v2351_v18  ;;  %v2334_v59 = vadd.f32 %v2333_v48, %v2332_v51  ;;  %v2350_v21 = vadd.f32 %v2349_v4, %v2348_v62  ;;  %v2409_v15 = vrot.slane %v2394_v43, 7 }
0x15e2   :  { %v2358_v41 = vsel %vm283_vm3, %v2326_v29, 0.0  ;;  %v2471_v34 = vsel %vm2072_vm15, %v2455_v10, %v2470_v35 }
0x15e3   :  { %v2354_v14 = vrot.slane %v2353_v39, 2  ;;  %v2359_v61 = vrot.slane %v2358_v41, 4  ;;  %v2310_v55 = vpop.permute.xlu0 %2309  ;;  %v2335_v24 = vrot.slane %v2334_v59, 1  ;;  %v2395_v35 = vmul.f32 %v2529_v63, %v2350_v21 }
0x15e4   :  { %v2327_v37 = vmul.f32 %v2310_v55, %v3945_v5  ;;  %v2459_v23 = vrot.slane %v2310_v55, %v4063_v27 }
0x15e5   :  { %v2360_v44 = vadd.f32 %v2359_v61, %v2358_v41  ;;  %v2355_v0 = vadd.f32 %v2354_v14, %v2353_v39  ;;  %v2336_v17 = vadd.f32 %v2335_v24, %v2334_v59 }
0x15e6   :  { %v2365_v13 = vsel %vm283_vm3, %v2327_v37, 0.0  ;;  %v2472_v26 = vsel %vm2074_vm0, %v2459_v23, %v2471_v34  ;;  %v2411_v34 = vrot.slane %v2395_v35, 6 }
0x15e7   :  { %v2361_v42 = vrot.slane %v2360_v44, 2  ;;  %v2366_v36 = vrot.slane %v2365_v13, 4  ;;  %v2315_v7 = vpop.permute.xlu0 %2314  ;;  %v2356_v56 = vrot.slane %v2355_v0, 1  ;;  %v2393_v25 = vmul.f32 %v2529_v63, %v2336_v17 }
0x15e8   :  { %v2328_v31 = vmul.f32 %v2315_v7, %v3926_v50  ;;  %v2463_v28 = vrot.slane %v2315_v7, %v4063_v27 }
0x15e9   :  { %v2362_v5 = vadd.f32 %v2361_v42, %v2360_v44  ;;  %v2367_v3 = vadd.f32 %v2366_v36, %v2365_v13  ;;  %v2357_v20 = vadd.f32 %v2356_v56, %v2355_v0  ;;  %v2410_v41 = vsel %vm2066_vm12, %v2409_v15, %v2393_v25  ;;  %v2530_v36 = vld [vmem:[#allocation2] ss:$0 sm:$0xff] }
0x15ea   :  { %v2372_v6 = vsel %vm283_vm3, %v2328_v31, 0.0  ;;  %v2473_v11 = vsel %vm2076_vm1, %v2463_v28, %v2472_v26  ;;  %v2412_v47 = vsel %vm2068_vm13, %v2411_v34, %v2410_v41 }
0x15eb   :  { %v2368_v32 = vrot.slane %v2367_v3, 2  ;;  %v2373_v40 = vrot.slane %v2372_v6, 4  ;;  %v2320_v22 = vpop.permute.xlu0 %2319  ;;  %v2363_v2 = vrot.slane %v2362_v5, 1  ;;  %v2396_v16 = vmul.f32 %v2529_v63, %v2357_v20 }
0x15ec   :  { %v2329_v45 = vmul.f32 %v2320_v22, %v3962_v58  ;;  %v2467_v50 = vrot.slane %v2320_v22, %v4063_v27 }
0x15ed   :  { %v2369_v19 = vadd.f32 %v2368_v32, %v2367_v3  ;;  %v2374_v30 = vadd.f32 %v2373_v40, %v2372_v6  ;;  %v2364_v58 = vadd.f32 %v2363_v2, %v2362_v5  ;;  %v2413_v53 = vrot.slane %v2396_v16, 5 }
0x15ee   :  { %v2379_v9 = vsel %vm283_vm3, %v2329_v45, 0.0  ;;  %v2474_v52 = vsel %vm2078_vm2, %v2467_v50, %v2473_v11 }
0x15ef   :  { %v2370_v8 = vrot.slane %v2369_v19, 1  ;;  %v2375_v54 = vrot.slane %v2374_v30, 2  ;;  %v2380_v46 = vrot.slane %v2379_v9, 4  ;;  %v2397_v33 = vmul.f32 %v2529_v63, %v2364_v58 }
0x15f0   :  { %v2414_v38 = vsel %vm2070_vm14, %v2413_v53, %v2412_v47 }
0x15f1   :  { %v2371_v27 = vadd.f32 %v2370_v8, %v2369_v19  ;;  %v2376_v12 = vadd.f32 %v2375_v54, %v2374_v30  ;;  %v2381_v60 = vadd.f32 %v2380_v46, %v2379_v9  ;;  %v2415_v14 = vrot.slane %v2397_v33, 4 }
0x15f3   :  { %v2377_v51 = vrot.slane %v2376_v12, 1  ;;  %v2382_v18 = vrot.slane %v2381_v60, 2  ;;  %v2398_v57 = vmul.f32 %v2529_v63, %v2371_v27  ;;  %v2416_v44 = vsel %vm2072_vm15, %v2415_v14, %v2414_v38 }
0x15f5   :  { %v2378_v29 = vadd.f32 %v2377_v51, %v2376_v12  ;;  %v2383_v10 = vadd.f32 %v2382_v18, %v2381_v60  ;;  %v2417_v55 = vrot.slane %v2398_v57, 3 }
0x15f7   :  { %v2384_v39 = vrot.slane %v2383_v10, 1  ;;  %v2399_v48 = vmul.f32 %v2529_v63, %v2378_v29  ;;  %v2418_v59 = vsel %vm2074_vm0, %v2417_v55, %v2416_v44 }
0x15f9   :  { %v2385_v61 = vadd.f32 %v2384_v39, %v2383_v10  ;;  %v2419_v37 = vrot.slane %v2399_v48, 2 }
0x15fb   :  { %v2400_v23 = vmul.f32 %v2529_v63, %v2385_v61  ;;  %v2420_v26 = vsel %vm2076_vm1, %v2419_v37, %v2418_v59 }
0x15fd   :  { %v2421_v13 = vrot.slane %v2400_v23, 1 }
0x15ff   :  { %v2422_v0 = vsel %vm2078_vm2, %v2421_v13, %v2420_v26 }
0x1600   :  { %v2424_v42 = vsel %vm283_vm3, %v2422_v0, 0.0 }
0x1601   :  { %2425 = vadd.xlane.f32.xlu0 %v2424_v42 }
0x168e   :  { %v2426_v7 = vpop.xlane.xlu0 %2425 }
0x168f   :  { %v2434_v62 = vadd.f32 %v2530_v36, %v2426_v7 }
0x1691   :  { %v2477_v31 = vsel %vm2476_vm5, %v2434_v62, %v2474_v52 }
0x1692   :  { %v2479_v28 = vsel %vm2478_vm6, %v2477_v31, 0.0 }
0x1693   :  { %2480 = vst [vmem:[#allocation9] sm:$0xff] %v2479_v28 }
0x1694   :  { %2882 = shalt.err (!%p2879_p0)
}
0x1695   :  { %s2883_s24 = scalar_lea.hbm %s4126_s7, 128 }
0x1696   :  { %p2884_p1 = scmp.ne.s32.totalorder %s4126_s7, %s2883_s24  ;;  %p2887_p2 = scmp.lt.u32.totalorder %s2883_s24, %s4126_s7 }
0x1698   :  { %p2889_p3 = pnand %p2887_p2, %p2884_p1 }
0x169a   :  { %2892 = shalt.err (!%p2889_p3)
}
0x169b   :  { %2490 = dma.vmem_to_hbm [thread:$0]  %s2488_s20, 128, %s4126_s7, [#allocation5]  }
0x169c   :  { %2897 = dma.done.wait [#allocation5], 128  }
0x169d   :  { %2898 = vsyncadd [#allocation5], 4294967168 }
0x169e   :  { %2494 = vsyncpa [#allocation4], 1 }
0x169f   :  { %2495 = vsyncpa [#allocation7], 1 }
0x16a0   :  { %2496 = vsyncpa [#allocation5], 1 }

</bundles_post_ra>
